<compile_context>
chip_gen: v6e
topology: v6e:2x2x1
jax: 0.10.0
libtpu: 0.0.40
codegen_flags: <defaults>
</compile_context>

<pallas_src>
import numpy as np
import jax
import jax.numpy as jnp
from jax.experimental import pallas as pl
from jax.experimental.pallas import tpu as pltpu

LRELU_SLOPE = 0.2
BN_EPS = 1e-5


def _vmem():
    return pl.BlockSpec(memory_space=pltpu.MemorySpace.VMEM)


# --------------------------- host-side preparation ---------------------------

def conv_toeplitz_np(w, H, W, stride, pad):
    """Unrolled-conv matrix T s.t. flatten_NCHW(conv(x)) = flatten_NCHW(x) @ T.

    w: (Cout, Cin, k, k) numpy.  Rows indexed ci*H*W + hi*W + wi, columns
    indexed co*Ho*Wo + oh*Wo + ow.  Zero rows implement the zero padding.
    """
    Cout, Cin, k, _ = w.shape
    Ho = (H + 2 * pad - k) // stride + 1
    Wo = (W + 2 * pad - k) // stride + 1
    T = np.zeros((Cin * H * W, Cout * Ho * Wo), np.float32)
    ci = np.arange(Cin)
    co = np.arange(Cout)
    for oh in range(Ho):
        for kh in range(k):
            hi = stride * oh + kh - pad
            if not (0 <= hi < H):
                continue
            for ow in range(Wo):
                for kw in range(k):
                    wi = stride * ow + kw - pad
                    if not (0 <= wi < W):
                        continue
                    rows = ci * (H * W) + hi * W + wi        # (Cin,)
                    cols = co * (Ho * Wo) + oh * Wo + ow     # (Cout,)
                    T[rows[:, None], cols[None, :]] = w[:, :, kh, kw].T
    return T, Ho, Wo


def prepare_netd(layers, final_w, isize, nc):
    """Precompute all kernel operands (Toeplitz mats, BN params, pooling mats)."""
    del nc  # channel count is implied by the first layer's weight shape
    H = W = isize
    meta, operands = [], []
    for L in layers:
        w = np.asarray(L["w"], np.float32)
        T, Ho, Wo = conv_toeplitz_np(w, H, W, L["s"], L["p"])
        Cout = w.shape[0]
        S = Ho * Wo
        N = Cout * S
        operands.append(jnp.asarray(T, jnp.bfloat16))           # MXU operand
        has_bn = L["kind"] == "conv_bn_lrelu"
        if has_bn:
            # channel-pooling matrix: column j of the activation belongs to
            # channel j // S (columns are in NCHW-flatten order).
            M = (np.arange(N)[:, None] // S == np.arange(Cout)[None, :])
            M = M.astype(np.float32)
            operands.append(jnp.asarray(np.asarray(L["g"], np.float32).reshape(1, Cout)))
            operands.append(jnp.asarray(np.asarray(L["b"], np.float32).reshape(1, Cout)))
            operands.append(jnp.asarray(M))                      # (N, Cout) pool
            operands.append(jnp.asarray(np.ascontiguousarray(M.T)))  # (Cout, N) bcast
        meta.append(dict(has_bn=has_bn, Cout=Cout, S=S, N=N))
        H, W = Ho, Wo

    assert H == 4 and W == 4, "classifier fold expects a 4x4 final feature map"
    # final 4x4 conv (Cout=1, no bias) == dot with NCHW-flattened features
    wc = np.asarray(final_w, np.float32).reshape(1, -1).T        # (N_last, 1)
    assert wc.shape[0] == meta[-1]["N"]
    operands.append(jnp.asarray(wc))
    feat_dims = (meta[-1]["Cout"], H, W)
    return meta, operands, feat_dims


# ------------------------------ fused kernel --------------------------------

def make_fused_kernel(meta, B):
    def kernel(*refs):
        it = iter(refs)
        x_ref = next(it)                                 # (B, D0) bf16
        layer_refs = []
        for m in meta:
            d = {"T": next(it)}                          # (Din, N) bf16
            if m["has_bn"]:
                d["g"] = next(it)                        # (1, Cout) f32
                d["b"] = next(it)                        # (1, Cout) f32
                d["M"] = next(it)                        # (N, Cout) f32
                d["MT"] = next(it)                       # (Cout, N) f32
            layer_refs.append(d)
        wc_ref = next(it)                                # (N_last, 1) f32
        feat_ref = next(it)                              # (B, N_last) f32 out
        cls_ref = next(it)                               # (B, 1) f32 out

        h = x_ref[...]                                   # bf16
        y = None
        for m, r in zip(meta, layer_refs):
            # conv as one lane-/K-dense 2-D MXU matmul, f32 accumulation.
            y = jnp.dot(h, r["T"][...], preferred_element_type=jnp.float32)
            if m["has_bn"]:
                # single-pass train-mode batch stats via channel-pooling matmuls
                inv_n = 1.0 / float(B * m["S"])
                s1 = jnp.dot(y, r["M"][...], preferred_element_type=jnp.float32)
                s2 = jnp.dot(y * y, r["M"][...], preferred_element_type=jnp.float32)
                mean_c = jnp.sum(s1, axis=0, keepdims=True) * inv_n      # (1, Cout)
                ex2_c = jnp.sum(s2, axis=0, keepdims=True) * inv_n       # (1, Cout)
                var_c = ex2_c - mean_c * mean_c                          # E[x^2]-E[x]^2
                a_c = r["g"][...] * jax.lax.rsqrt(var_c + BN_EPS)        # scale
                b_c = r["b"][...] - mean_c * a_c                         # shift
                # broadcast per-channel scale/shift back over the N columns (MXU)
                a_cols = jnp.dot(a_c, r["MT"][...], preferred_element_type=jnp.float32)
                b_cols = jnp.dot(b_c, r["MT"][...], preferred_element_type=jnp.float32)
                y = y * a_cols + b_cols
            # LeakyReLU(0.2)
            y = jnp.where(y > 0, y, LRELU_SLOPE * y)
            h = y.astype(jnp.bfloat16)                   # MXU operand for next layer

        feat_ref[...] = y                                # lane-dense (B, N_last) f32
        # classifier = final 4x4 conv folded as a flattened-features dot
        cls_ref[...] = jnp.dot(y, wc_ref[...], preferred_element_type=jnp.float32)

    return kernel


# --------------------------------- forward -----------------------------------

def netd_forward(x_nchw, meta, operands, feat_dims):
    B = x_nchw.shape[0]
    Cf, Hf, Wf = feat_dims
    N_last = meta[-1]["N"]
    # NCHW flatten matches the Toeplitz row ordering; single cheap relayout.
    x_flat = x_nchw.reshape(B, -1).astype(jnp.bfloat16)
    all_inputs = [x_flat] + list(operands)

    flops = 0
    D = x_flat.shape[1]
    for m in meta:
        flops += 2 * B * D * m["N"]
        if m["has_bn"]:
            flops += 4 * B * m["N"] * m["Cout"] + 4 * m["Cout"] * m["N"]
        D = m["N"]
    flops += 2 * B * N_last
    bytes_accessed = sum(int(a.size) * int(a.dtype.itemsize) for a in all_inputs)
    bytes_accessed += B * N_last * 4 + B * 4

    feat_flat, cls = pl.pallas_call(
        make_fused_kernel(meta, B),
        out_shape=(jax.ShapeDtypeStruct((B, N_last), jnp.float32),
                   jax.ShapeDtypeStruct((B, 1), jnp.float32)),
        in_specs=[_vmem() for _ in all_inputs],
        out_specs=(_vmem(), _vmem()),
        compiler_params=pltpu.CompilerParams(
            # whole-net VMEM footprint is ~1.5 MiB; 32 MiB fits every
            # generation (v5e/v6e 128 MiB, v7x 64 MiB physical) with headroom.
            vmem_limit_bytes=32 * 1024 * 1024),
        cost_estimate=pl.CostEstimate(
            flops=flops,
            transcendentals=sum(m["Cout"] for m in meta if m["has_bn"]),
            bytes_accessed=bytes_accessed),
    )(*all_inputs)

    features = feat_flat.reshape(B, Cf, Hf, Wf)   # columns already in NCHW order
    classifier = cls.reshape(-1)                  # .view(-1, 1).squeeze(1)
    return classifier, features


# ----------------------------- parameter init --------------------------------

def init_netd_params(key, isize, nc, ngf, n_extra_layers=0):
    assert isize % 16 == 0, "isize has to be a multiple of 16"
    keys = iter(jax.random.split(key, 64))

    def nrm(shape, scale=0.02):
        return scale * jax.random.normal(next(keys), shape, jnp.float32)

    layers = []
    # initial conv (nc -> ngf, 4, 2, 1) + LeakyReLU
    layers.append(dict(kind="conv_lrelu", w=nrm((ngf, nc, 4, 4)), k=4, s=2, p=1))
    csize, cndf = isize // 2, ngf
    # extra layers: conv 3x3 s1 p1 + BN + LeakyReLU
    for _ in range(n_extra_layers):
        layers.append(dict(kind="conv_bn_lrelu", w=nrm((cndf, cndf, 3, 3)),
                           g=1.0 + nrm((cndf,), 0.1), b=nrm((cndf,), 0.1),
                           k=3, s=1, p=1))
    # pyramid blocks: conv 4x4 s2 p1 + BN + LeakyReLU
    while csize > 4:
        layers.append(dict(kind="conv_bn_lrelu", w=nrm((cndf * 2, cndf, 4, 4)),
                           g=1.0 + nrm((cndf * 2,), 0.1), b=nrm((cndf * 2,), 0.1),
                           k=4, s=2, p=1))
        cndf *= 2
        csize //= 2
    # final conv (cndf -> nz=1, 4, 1, 0), no bias -> "classifier"
    final_w = nrm((1, cndf, 4, 4))
    return layers, final_w


# --------------------------- pure-JAX reference -------------------------------

def netd_reference(x, layers, final_w):
    h = x
    for L in layers:
        h = jax.lax.conv_general_dilated(
            h, L["w"], window_strides=(L["s"], L["s"]),
            padding=[(L["p"], L["p"]), (L["p"], L["p"])],
            dimension_numbers=("NCHW", "OIHW", "NCHW"))
        if L["kind"] == "conv_bn_lrelu":
            mean = jnp.mean(h, axis=(0, 2, 3), keepdims=True)
            var = jnp.mean((h - mean) ** 2, axis=(0, 2, 3), keepdims=True)
            h = (h - mean) * jax.lax.rsqrt(var + BN_EPS)
            h = h * L["g"].reshape(1, -1, 1, 1) + L["b"].reshape(1, -1, 1, 1)
        h = jnp.where(h > 0, h, LRELU_SLOPE * h)
    feats = h
    cls = jax.lax.conv_general_dilated(
        feats, final_w, (1, 1), [(0, 0), (0, 0)],
        dimension_numbers=("NCHW", "OIHW", "NCHW"))
    return cls.reshape(-1), feats


# ---------------------------------- main --------------------------------------

if __name__ == "__main__":
    # small config: isize=16, nc=4, ngf=8, ngpu=1, extralayers=0
    isize, nc, ngf, n_extra = 16, 4, 8, 0
    batch = 2

    key = jax.random.PRNGKey(0)
    k_params, k_x = jax.random.split(key)
    layers, final_w = init_netd_params(k_params, isize, nc, ngf, n_extra)
    x = jax.random.normal(k_x, (batch, nc, isize, isize), jnp.float32)

    meta, operands, feat_dims = prepare_netd(layers, final_w, isize, nc)

    fwd = jax.jit(lambda xx: netd_forward(xx, meta, operands, feat_dims))
    classifier, features = fwd(x)
    jax.block_until_ready((classifier, features))

    assert classifier.shape == (batch,), classifier.shape
    assert features.shape == (batch, ngf * 2, 4, 4), features.shape

    # loose-tolerance check vs. a pure-f32 JAX reference (kernel matmuls are bf16)
    cls_ref, feat_ref = jax.jit(lambda xx: netd_reference(xx, layers, final_w))(x)
    np.testing.assert_allclose(np.asarray(features), np.asarray(feat_ref),
                               rtol=1e-1, atol=1e-1)
    np.testing.assert_allclose(np.asarray(classifier), np.asarray(cls_ref),
                               rtol=1e-1, atol=1e-1)

    print("KERNEL_OK")
</pallas_src>

<mosaic_0001>
module attributes {stable_mosaic.version = 11 : i64} {
  func.func @kernel(%arg0: memref<2x1024xbf16, #tpu.memory_space<vmem>>, %arg1: memref<1024x512xbf16, #tpu.memory_space<vmem>>, %arg2: memref<512x256xbf16, #tpu.memory_space<vmem>>, %arg3: memref<1x16xf32, #tpu.memory_space<vmem>>, %arg4: memref<1x16xf32, #tpu.memory_space<vmem>>, %arg5: memref<256x16xf32, #tpu.memory_space<vmem>>, %arg6: memref<16x256xf32, #tpu.memory_space<vmem>>, %arg7: memref<256x1xf32, #tpu.memory_space<vmem>>, %arg8: memref<2x256xf32, #tpu.memory_space<vmem>>, %arg9: memref<2x1xf32, #tpu.memory_space<vmem>>) attributes {dimension_semantics = [], scalar_prefetch = 0 : i64, scratch_operands = 0 : i64, tpu.core_type = #tpu.core_type<tc>} {
    %c0 = arith.constant 0 : index
    %c0_0 = arith.constant 0 : index
    %0 = vector.load %arg0[%c0, %c0_0] : memref<2x1024xbf16, #tpu.memory_space<vmem>>, vector<2x1024xbf16>
    %c0_1 = arith.constant 0 : index
    %c0_2 = arith.constant 0 : index
    %1 = vector.load %arg1[%c0_1, %c0_2] : memref<1024x512xbf16, #tpu.memory_space<vmem>>, vector<1024x512xbf16>
    %cst = arith.constant dense<0.000000e+00> : vector<2x512xf32>
    %2 = tpu.matmul %0, %1, %cst {dimension_numbers = #tpu.dot_dimension_numbers<[1], [0], [0], [1], [0, 0, 1, 1], [], []>} : vector<2x1024xbf16>, vector<1024x512xbf16>, vector<2x512xf32> -> vector<2x512xf32>
    %cst_3 = arith.constant 0.000000e+00 : f32
    %3 = vector.broadcast %cst_3 : f32 to vector<2x512xf32>
    %4 = arith.cmpf ogt, %2, %3 : vector<2x512xf32>
    %cst_4 = arith.constant 2.000000e-01 : f32
    %5 = vector.broadcast %cst_4 : f32 to vector<2x512xf32>
    %6 = arith.mulf %5, %2 : vector<2x512xf32>
    %7 = arith.select %4, %2, %6 : vector<2x512xi1>, vector<2x512xf32>
    %8 = arith.truncf %7 : vector<2x512xf32> to vector<2x512xbf16>
    %c0_5 = arith.constant 0 : index
    %c0_6 = arith.constant 0 : index
    %9 = vector.load %arg2[%c0_5, %c0_6] : memref<512x256xbf16, #tpu.memory_space<vmem>>, vector<512x256xbf16>
    %cst_7 = arith.constant dense<0.000000e+00> : vector<2x256xf32>
    %10 = tpu.matmul %8, %9, %cst_7 {dimension_numbers = #tpu.dot_dimension_numbers<[1], [0], [0], [1], [0, 0, 1, 1], [], []>} : vector<2x512xbf16>, vector<512x256xbf16>, vector<2x256xf32> -> vector<2x256xf32>
    %c0_8 = arith.constant 0 : index
    %c0_9 = arith.constant 0 : index
    %11 = vector.load %arg5[%c0_8, %c0_9] : memref<256x16xf32, #tpu.memory_space<vmem>>, vector<256x16xf32>
    %cst_10 = arith.constant dense<0.000000e+00> : vector<2x16xf32>
    %12 = tpu.matmul %10, %11, %cst_10 {dimension_numbers = #tpu.dot_dimension_numbers<[1], [0], [0], [1], [0, 0, 1, 1], [], []>} : vector<2x256xf32>, vector<256x16xf32>, vector<2x16xf32> -> vector<2x16xf32>
    %13 = arith.mulf %10, %10 : vector<2x256xf32>
    %c0_11 = arith.constant 0 : index
    %c0_12 = arith.constant 0 : index
    %14 = vector.load %arg5[%c0_11, %c0_12] : memref<256x16xf32, #tpu.memory_space<vmem>>, vector<256x16xf32>
    %cst_13 = arith.constant dense<0.000000e+00> : vector<2x16xf32>
    %15 = tpu.matmul %13, %14, %cst_13 {dimension_numbers = #tpu.dot_dimension_numbers<[1], [0], [0], [1], [0, 0, 1, 1], [], []>} : vector<2x256xf32>, vector<256x16xf32>, vector<2x16xf32> -> vector<2x16xf32>
    %cst_14 = arith.constant dense<0.000000e+00> : vector<16xf32>
    %16 = vector.multi_reduction <add>, %12, %cst_14 [0] : vector<2x16xf32> to vector<16xf32>
    %17 = vector.shape_cast %16 : vector<16xf32> to vector<1x16xf32>
    %cst_15 = arith.constant 3.125000e-02 : f32
    %18 = vector.broadcast %cst_15 : f32 to vector<1x16xf32>
    %19 = arith.mulf %17, %18 : vector<1x16xf32>
    %cst_16 = arith.constant dense<0.000000e+00> : vector<16xf32>
    %20 = vector.multi_reduction <add>, %15, %cst_16 [0] : vector<2x16xf32> to vector<16xf32>
    %21 = vector.shape_cast %20 : vector<16xf32> to vector<1x16xf32>
    %cst_17 = arith.constant 3.125000e-02 : f32
    %22 = vector.broadcast %cst_17 : f32 to vector<1x16xf32>
    %23 = arith.mulf %21, %22 : vector<1x16xf32>
    %24 = arith.mulf %19, %19 : vector<1x16xf32>
    %25 = arith.subf %23, %24 : vector<1x16xf32>
    %c0_18 = arith.constant 0 : index
    %c0_19 = arith.constant 0 : index
    %26 = vector.load %arg3[%c0_18, %c0_19] : memref<1x16xf32, #tpu.memory_space<vmem>>, vector<1x16xf32>
    %cst_20 = arith.constant 9.99999974E-6 : f32
    %27 = vector.broadcast %cst_20 : f32 to vector<1x16xf32>
    %28 = arith.addf %25, %27 : vector<1x16xf32>
    %29 = math.rsqrt %28 : vector<1x16xf32>
    %30 = arith.mulf %26, %29 : vector<1x16xf32>
    %c0_21 = arith.constant 0 : index
    %c0_22 = arith.constant 0 : index
    %31 = vector.load %arg4[%c0_21, %c0_22] : memref<1x16xf32, #tpu.memory_space<vmem>>, vector<1x16xf32>
    %32 = arith.mulf %19, %30 : vector<1x16xf32>
    %33 = arith.subf %31, %32 : vector<1x16xf32>
    %c0_23 = arith.constant 0 : index
    %c0_24 = arith.constant 0 : index
    %34 = vector.load %arg6[%c0_23, %c0_24] : memref<16x256xf32, #tpu.memory_space<vmem>>, vector<16x256xf32>
    %cst_25 = arith.constant dense<0.000000e+00> : vector<1x256xf32>
    %35 = tpu.matmul %30, %34, %cst_25 {dimension_numbers = #tpu.dot_dimension_numbers<[1], [0], [0], [1], [0, 0, 1, 1], [], []>} : vector<1x16xf32>, vector<16x256xf32>, vector<1x256xf32> -> vector<1x256xf32>
    %c0_26 = arith.constant 0 : index
    %c0_27 = arith.constant 0 : index
    %36 = vector.load %arg6[%c0_26, %c0_27] : memref<16x256xf32, #tpu.memory_space<vmem>>, vector<16x256xf32>
    %cst_28 = arith.constant dense<0.000000e+00> : vector<1x256xf32>
    %37 = tpu.matmul %33, %36, %cst_28 {dimension_numbers = #tpu.dot_dimension_numbers<[1], [0], [0], [1], [0, 0, 1, 1], [], []>} : vector<1x16xf32>, vector<16x256xf32>, vector<1x256xf32> -> vector<1x256xf32>
    %38 = vector.broadcast %35 : vector<1x256xf32> to vector<2x256xf32>
    %39 = arith.mulf %10, %38 : vector<2x256xf32>
    %40 = vector.broadcast %37 : vector<1x256xf32> to vector<2x256xf32>
    %41 = arith.addf %39, %40 : vector<2x256xf32>
    %cst_29 = arith.constant 0.000000e+00 : f32
    %42 = vector.broadcast %cst_29 : f32 to vector<2x256xf32>
    %43 = arith.cmpf ogt, %41, %42 : vector<2x256xf32>
    %cst_30 = arith.constant 2.000000e-01 : f32
    %44 = vector.broadcast %cst_30 : f32 to vector<2x256xf32>
    %45 = arith.mulf %44, %41 : vector<2x256xf32>
    %46 = arith.select %43, %41, %45 : vector<2x256xi1>, vector<2x256xf32>
    %c0_31 = arith.constant 0 : index
    %c0_32 = arith.constant 0 : index
    %47 = vector.load %arg8[%c0_31, %c0_32] : memref<2x256xf32, #tpu.memory_space<vmem>>, vector<2x256xf32>
    tpu.vector_store %arg8[%c0_31, %c0_32], %46 {strides = array<i32>} : memref<2x256xf32, #tpu.memory_space<vmem>>, vector<2x256xf32>,
    %c0_33 = arith.constant 0 : index
    %c0_34 = arith.constant 0 : index
    %48 = vector.load %arg7[%c0_33, %c0_34] : memref<256x1xf32, #tpu.memory_space<vmem>>, vector<256x1xf32>
    %cst_35 = arith.constant dense<0.000000e+00> : vector<2x1xf32>
    %49 = tpu.matmul %46, %48, %cst_35 {dimension_numbers = #tpu.dot_dimension_numbers<[1], [0], [0], [1], [0, 0, 1, 1], [], []>} : vector<2x256xf32>, vector<256x1xf32>, vector<2x1xf32> -> vector<2x1xf32>
    %c0_36 = arith.constant 0 : index
    %c0_37 = arith.constant 0 : index
    %50 = vector.load %arg9[%c0_36, %c0_37] : memref<2x1xf32, #tpu.memory_space<vmem>>, vector<2x1xf32>
    tpu.vector_store %arg9[%c0_36, %c0_37], %49 {strides = array<i32>} : memref<2x1xf32, #tpu.memory_space<vmem>>, vector<2x1xf32>,
    return
  }
}

</mosaic_0001>

<bundles_post_ra>
// kernel: _lambda_.1
= control target key start
LH: loop header
LB: loop body
LE: loop exit
PB: predicated region body
PF: predicated region fallthrough
CT: control target
= control target key end

     0   :  { %15 = vsyncpa [#allocation3], 0  ;;  %s4323_s0 = inlined_call_operand.vmem [shape: bf16[2,1024], index: 0, kind: input, shape index: {}]   ;;  %s4324_s1 = inlined_call_operand.hbm [shape: bf16[1024,512], index: 1, kind: input, shape index: {}]   ;;  %s4325_s2 = inlined_call_operand.hbm [shape: bf16[512,256], index: 2, kind: input, shape index: {}]   ;;  %s4326_s3 = inlined_call_operand.vmem [shape: f32[1,16], index: 3, kind: input, shape index: {}]   ;;  %s4327_s4 = inlined_call_operand.vmem [shape: f32[1,16], index: 4, kind: input, shape index: {}]   ;;  %s4328_s5 = inlined_call_operand.hbm [shape: f32[256,16], index: 5, kind: input, shape index: {}]   ;;  %s4329_s6 = inlined_call_operand.hbm [shape: f32[16,256], index: 6, kind: input, shape index: {}]   ;;  %s4330_s7 = inlined_call_operand.vmem [shape: f32[256,1], index: 7, kind: input, shape index: {}]   ;;  %s4331_s8 = inlined_call_operand.vmem [shape: f32[2,256], index: 8, kind: output, shape index: {0}]   ;;  %s4332_s9 = inlined_call_operand.vmem [shape: f32[2,1], index: 9, kind: output, shape index: {1}]  }
   0x1   :  { %16 = vsyncpa [#allocation5], 0 }
   0x2   :  { %17 = vsyncpa [#allocation8], 0  ;;  %s4004_s30 = smov [#allocation4]  }
   0x3   :  { %s37_s10 = sshll.u32 %s4004_s30, 4  ;;  %s38_s10 = int_to_ptr.vmem [resolvable:$true] %s37_s10 }
   0x4   :  { %s3926_s11 = scalar_lea.vmem %s38_s10, 8192  ;;  %p3931_p1 = scmp.lt.s32.totalorder %s38_s10, %s38_s10 }
   0x5   :  { %p3927_p0 = scmp.ne.s32.totalorder %s38_s10, %s3926_s11  ;;  %p3932_p2 = scmp.lt.s32.totalorder %s3926_s11, %s3926_s11 }
   0x7   :  { %p3933_p3 = por %p3932_p2, %p3931_p1 }
   0x9   :  { %p3934_p4 = pnand %p3933_p3, %p3927_p0 }
   0xb   :  { %3937 = shalt.err (!%p3934_p4)
}
   0xc   :  { %s4005_s12 = smov 128   ;;  %s4006_s13 = smov 8  }
   0xd   :  { %43 = dma.hbm_to_vmem [thread:$0]  %s4325_s2, 8192, %s38_s10, [#allocation5], %s4005_s12, %s4005_s12, %s4006_s13  }
   0xe   :  { %s4007_s16 = smov [#allocation2]  }
   0xf   :  { %s25_s17 = sshll.u32 %s4007_s16, 4  ;;  %s26_s17 = int_to_ptr.vmem [resolvable:$true] %s25_s17 }
  0x10   :  { %s3946_s18 = scalar_lea.vmem %s26_s17, 32768  ;;  %p3951_p6 = scmp.lt.s32.totalorder %s26_s17, %s26_s17 }
  0x11   :  { %p3947_p5 = scmp.ne.s32.totalorder %s26_s17, %s3946_s18  ;;  %p3952_p7 = scmp.lt.s32.totalorder %s3946_s18, %s3946_s18 }
  0x13   :  { %p3953_p8 = por %p3952_p7, %p3951_p6 }
  0x15   :  { %p3954_p9 = pnand %p3953_p8, %p3947_p5 }
  0x17   :  { %3957 = shalt.err (!%p3954_p9)
}
  0x18   :  { %s4008_s19 = smov 256   ;;  %s4009_s20 = smov 16  }
  0x19   :  { %31 = dma.hbm_to_vmem [thread:$0]  %s4324_s1, 32768, %s26_s17, [#allocation3], %s4008_s19, %s4008_s19, %s4009_s20  }
  0x1a   :  { %s4010_s23 = smov [#allocation6]   ;;  %s4011_s25 = smov [#allocation7]  }
  0x1b   :  { %s53_s24 = sshll.u32 %s4010_s23, 4  ;;  %s65_s2 = sshll.u32 %s4011_s25, 4  ;;  %s54_s24 = int_to_ptr.vmem [resolvable:$true] %s53_s24  ;;  %s66_s2 = int_to_ptr.vmem [resolvable:$true] %s65_s2 }
  0x1c   :  { %s3966_s26 = scalar_lea.vmem %s54_s24, 4096  ;;  %p3971_p11 = scmp.lt.s32.totalorder %s54_s24, %s54_s24 }
  0x1d   :  { %p3967_p10 = scmp.ne.s32.totalorder %s54_s24, %s3966_s26  ;;  %p3972_p12 = scmp.lt.s32.totalorder %s3966_s26, %s3966_s26 }
  0x1f   :  { %p3973_p13 = por %p3972_p12, %p3971_p11 }
  0x21   :  { %p3974_p0 = pnand %p3973_p13, %p3967_p10 }
  0x23   :  { %3977 = shalt.err (!%p3974_p0)
}
  0x24   :  { %59 = dma.hbm_to_vmem [thread:$0]  %s4328_s5, 4096, %s54_s24, [#allocation5], %s4005_s12, %s4005_s12, %s4006_s13  }
  0x25   :  { %s3986_s1 = scalar_lea.vmem %s66_s2, 512  ;;  %p3991_p2 = scmp.lt.s32.totalorder %s66_s2, %s66_s2 }
  0x26   :  { %p3987_p1 = scmp.ne.s32.totalorder %s66_s2, %s3986_s1  ;;  %p3992_p3 = scmp.lt.s32.totalorder %s3986_s1, %s3986_s1 }
  0x28   :  { %p3993_p4 = por %p3992_p3, %p3991_p2 }
  0x2a   :  { %p3994_p5 = pnand %p3993_p4, %p3987_p1 }
  0x2c   :  { %3997 = shalt.err (!%p3994_p5)
}
  0x2d   :  { %71 = dma.hbm_to_vmem [thread:$0]  %s4329_s6, 512, %s66_s2, [#allocation8], %s4008_s19, %s4008_s19, %s4009_s20  }
  0x2e   :  { %3998 = dma.done.wait [#allocation3], 32768  }
  0x2f   :  { %3999 = vsyncadd [#allocation3], 4294934528 }
  0x30   :  { %4000 = dma.done.wait [#allocation5], 12288  }
  0x31   :  { %4001 = vsyncadd [#allocation5], 4294955008 }
  0x32   :  { %4002 = dma.done.wait [#allocation8], 512  }
  0x33   :  { %4003 = vsyncadd [#allocation8], 4294966784  ;;  %v3435_v0 = vld [vmem:[#allocation2 + $0xe4] ss:$16 sps:$4 sm:$0xff]   ;;  %v3439_v2 = vld [vmem:[#allocation2 + $0xe0] ss:$16 sps:$4 sm:$0xff]   ;;  %v348_v38 = vlaneseq }
  0x34   :  { %v3437_v1 = vld [vmem:[#allocation2 + $0x2e4] ss:$16 sps:$4 sm:$0xff]   ;;  %1681 = vmatprep.subr.bf16.mxu0 %v3435_v0  ;;  %v3440_v3 = vld [vmem:[#allocation2 + $0x2e0] ss:$16 sps:$4 sm:$0xff]   ;;  %v4012_v36 = vmov 1966171168  }
  0x35   :  { %1722 = vmatprep.subr.bf16.mxu1 %v3437_v1  ;;  %v3441_v4 = vld [vmem:[#allocation2 + $0xc4] ss:$16 sps:$4 sm:$0xff]   ;;  %1682 = vmatpush1.bf16.msra.mxu0 %v3439_v2  ;;  %v3445_v6 = vld [vmem:[#allocation2 + $0xc0] ss:$16 sps:$4 sm:$0xff]   ;;  %v346_v37 = vunpack.c.l.s4 %v4012_v36  ;;  %v4082_v43 = vshrl.u32 %v348_v38, 7  ;;  %vm2665_vm4 = vcmask 123904  }
  0x36   :  { %1723 = vmatpush1.bf16.msra.mxu1 %v3440_v3  ;;  %v3443_v5 = vld [vmem:[#allocation2 + $0x2c4] ss:$16 sps:$4 sm:$0xff]   ;;  %1683 = vmatprep.subr.bf16.mxu0 %v3441_v4  ;;  %v3446_v7 = vld [vmem:[#allocation2 + $0x2c0] ss:$16 sps:$4 sm:$0xff]   ;;  %vm2695_vm5 = vcmask 130048   ;;  %vm2984_vm8 = vcmask 1024  }
  0x37   :  { %1724 = vmatprep.subr.bf16.mxu1 %v3443_v5  ;;  %v3447_v8 = vld [vmem:[#allocation2 + $0xa4] ss:$16 sps:$4 sm:$0xff]   ;;  %v3451_v10 = vld [vmem:[#allocation2 + $0xa0] ss:$16 sps:$4 sm:$0xff]   ;;  %v347_v42 = vunpack.c.0.s8 %v346_v37 }
  0x38   :  { %v3449_v9 = vld [vmem:[#allocation2 + $0x2a4] ss:$16 sps:$4 sm:$0xff]   ;;  %v3452_v11 = vld [vmem:[#allocation2 + $0x2a0] ss:$16 sps:$4 sm:$0xff]  }
  0x39   :  { %1684 = vmatpush1.bf16.msra.mxu0 %v3445_v6  ;;  %v3453_v12 = vld [vmem:[#allocation2 + $0x84] ss:$16 sps:$4 sm:$0xff]   ;;  %v3457_v14 = vld [vmem:[#allocation2 + $0x80] ss:$16 sps:$4 sm:$0xff]   ;;  %v350_v49 = vsub.s32 %v347_v42, %v4082_v43 }
  0x3a   :  { %1725 = vmatpush1.bf16.msra.mxu1 %v3446_v7  ;;  %1685 = vmatprep.subr.bf16.mxu0 %v3447_v8  ;;  %v3455_v13 = vld [vmem:[#allocation2 + $0x284] ss:$16 sps:$4 sm:$0xff]   ;;  %v3458_v15 = vld [vmem:[#allocation2 + $0x280] ss:$16 sps:$4 sm:$0xff]  }
  0x3b   :  { %1726 = vmatprep.subr.bf16.mxu1 %v3449_v9  ;;  %v3459_v16 = vld [vmem:[#allocation2 + $0x64] ss:$16 sps:$4 sm:$0xff]   ;;  %v3463_v18 = vld [vmem:[#allocation2 + $0x60] ss:$16 sps:$4 sm:$0xff]  }
  0x3c   :  { %v3461_v17 = vld [vmem:[#allocation2 + $0x264] ss:$16 sps:$4 sm:$0xff]   ;;  %v3464_v19 = vld [vmem:[#allocation2 + $0x260] ss:$16 sps:$4 sm:$0xff]  }
  0x3d   :  { %1686 = vmatpush1.bf16.msra.mxu0 %v3451_v10  ;;  %v3465_v20 = vld [vmem:[#allocation2 + $0x44] ss:$16 sps:$4 sm:$0xff]   ;;  %v3469_v22 = vld [vmem:[#allocation2 + $0x40] ss:$16 sps:$4 sm:$0xff]  }
  0x3e   :  { %1727 = vmatpush1.bf16.msra.mxu1 %v3452_v11  ;;  %1687 = vmatprep.subr.bf16.mxu0 %v3453_v12  ;;  %v3467_v21 = vld [vmem:[#allocation2 + $0x244] ss:$16 sps:$4 sm:$0xff]   ;;  %v3470_v23 = vld [vmem:[#allocation2 + $0x240] ss:$16 sps:$4 sm:$0xff]  }
  0x3f   :  { %1728 = vmatprep.subr.bf16.mxu1 %v3455_v13  ;;  %v3471_v24 = vld [vmem:[#allocation2 + $0x24] ss:$16 sps:$4 sm:$0xff]   ;;  %v3475_v26 = vld [vmem:[#allocation2 + $0x20] ss:$16 sps:$4 sm:$0xff]  }
  0x40   :  { %v3473_v25 = vld [vmem:[#allocation2 + $0x224] ss:$16 sps:$4 sm:$0xff]   ;;  %v3476_v27 = vld [vmem:[#allocation2 + $0x220] ss:$16 sps:$4 sm:$0xff]  }
  0x41   :  { %1688 = vmatpush1.bf16.msra.mxu0 %v3457_v14  ;;  %v3477_v28 = vld [vmem:[#allocation2 + $0x4] ss:$16 sps:$4 sm:$0xff]   ;;  %v3481_v30 = vld [vmem:[#allocation2] ss:$16 sps:$4 sm:$0xff]  }
  0x42   :  { %1729 = vmatpush1.bf16.msra.mxu1 %v3458_v15  ;;  %1689 = vmatprep.subr.bf16.mxu0 %v3459_v16  ;;  %v3479_v29 = vld [vmem:[#allocation2 + $0x204] ss:$16 sps:$4 sm:$0xff]   ;;  %v3482_v31 = vld [vmem:[#allocation2 + $0x200] ss:$16 sps:$4 sm:$0xff]  }
  0x43   :  { %1730 = vmatprep.subr.bf16.mxu1 %v3461_v17  ;;  %v3483_v32 = vld [vmem:[#allocation2 + $0x1e4] ss:$16 sps:$4 sm:$0xff]   ;;  %v3487_v34 = vld [vmem:[#allocation2 + $0x1e0] ss:$16 sps:$4 sm:$0xff]  }
  0x44   :  { %v3485_v33 = vld [vmem:[#allocation2 + $0x3e4] ss:$16 sps:$4 sm:$0xff]   ;;  %v3488_v35 = vld [vmem:[#allocation2 + $0x3e0] ss:$16 sps:$4 sm:$0xff]  }
  0x45   :  { %1690 = vmatpush1.bf16.msra.mxu0 %v3463_v18  ;;  %v3489_v39 = vld [vmem:[#allocation2 + $0x1c4] ss:$16 sps:$4 sm:$0xff]   ;;  %v3493_v41 = vld [vmem:[#allocation2 + $0x1c0] ss:$16 sps:$4 sm:$0xff]  }
  0x46   :  { %1731 = vmatpush1.bf16.msra.mxu1 %v3464_v19  ;;  %1691 = vmatprep.subr.bf16.mxu0 %v3465_v20  ;;  %v3491_v40 = vld [vmem:[#allocation2 + $0x3c4] ss:$16 sps:$4 sm:$0xff]   ;;  %v3494_v44 = vld [vmem:[#allocation2 + $0x3c0] ss:$16 sps:$4 sm:$0xff]  }
  0x47   :  { %1732 = vmatprep.subr.bf16.mxu1 %v3467_v21  ;;  %v3495_v45 = vld [vmem:[#allocation2 + $0x1a4] ss:$16 sps:$4 sm:$0xff]   ;;  %v3499_v47 = vld [vmem:[#allocation2 + $0x1a0] ss:$16 sps:$4 sm:$0xff]  }
  0x48   :  { %v3497_v46 = vld [vmem:[#allocation2 + $0x3a4] ss:$16 sps:$4 sm:$0xff]   ;;  %v3500_v48 = vld [vmem:[#allocation2 + $0x3a0] ss:$16 sps:$4 sm:$0xff]  }
  0x49   :  { %1692 = vmatpush1.bf16.msra.mxu0 %v3469_v22  ;;  %v3501_v50 = vld [vmem:[#allocation2 + $0x184] ss:$16 sps:$4 sm:$0xff]   ;;  %v3505_v53 = vld [vmem:[#allocation2 + $0x180] ss:$16 sps:$4 sm:$0xff]  }
  0x4a   :  { %1733 = vmatpush1.bf16.msra.mxu1 %v3470_v23  ;;  %1693 = vmatprep.subr.bf16.mxu0 %v3471_v24  ;;  %v3503_v51 = vld [vmem:[#allocation2 + $0x384] ss:$16 sps:$4 sm:$0xff]   ;;  %v3506_v56 = vld [vmem:[#allocation2 + $0x380] ss:$16 sps:$4 sm:$0xff]  }
  0x4b   :  { %1734 = vmatprep.subr.bf16.mxu1 %v3473_v25  ;;  %v86_v52 = vld [vmem:[%s4323_s0] sm:$0xff] }
  0x4c   :  { %v351_v54 = vrot.slane %v86_v52, %v350_v49  ;;  %v344_v55 = vcombine.high %v86_v52, %v86_v52  ;;  %v3507_v57 = vld [vmem:[#allocation2 + $0x164] ss:$16 sps:$4 sm:$0xff]   ;;  %v3511_v61 = vld [vmem:[#allocation2 + $0x160] ss:$16 sps:$4 sm:$0xff]  }
  0x4d   :  { %1694 = vmatpush1.bf16.msra.mxu0 %v3475_v26  ;;  %v3509_v58 = vld [vmem:[#allocation2 + $0x364] ss:$16 sps:$4 sm:$0xff]   ;;  %v3512_v0 = vld [vmem:[#allocation2 + $0x360] ss:$16 sps:$4 sm:$0xff]  }
  0x4e   :  { %1735 = vmatpush1.bf16.msra.mxu1 %v3476_v27  ;;  %1695 = vmatprep.subr.bf16.mxu0 %v3477_v28  ;;  %v359_v59 = vcombine.high %v351_v54, %v351_v54  ;;  %v358_v60 = vrot.slane %v344_v55, %v350_v49  ;;  %v3513_v1 = vld [vmem:[#allocation2 + $0x144] ss:$16 sps:$4 sm:$0xff]   ;;  %v3517_v4 = vld [vmem:[#allocation2 + $0x140] ss:$16 sps:$4 sm:$0xff]   ;;  %v4098_v14 = vrot.slane %v351_v54, %v350_v49 }
  0x4f   :  { %1736 = vmatprep.subr.bf16.mxu1 %v3479_v29  ;;  %v3515_v2 = vld [vmem:[#allocation2 + $0x344] ss:$16 sps:$4 sm:$0xff]   ;;  %v3518_v5 = vld [vmem:[#allocation2 + $0x340] ss:$16 sps:$4 sm:$0xff]  }
  0x50   :  { %v4088_v62 = vrot.slane %v359_v59, %v350_v49  ;;  %v4090_v63 = vrot.slane %v358_v60, %v350_v49  ;;  %v3519_v6 = vld [vmem:[#allocation2 + $0x124] ss:$16 sps:$4 sm:$0xff]   ;;  %v3523_v8 = vld [vmem:[#allocation2 + $0x120] ss:$16 sps:$4 sm:$0xff]   ;;  %v360_v12 = vcombine.high %v358_v60, %v358_v60  ;;  %v4104_v19 = vcombine.high %v4098_v14, %v4098_v14 }
  0x51   :  { %1696 = vmatpush1.bf16.msra.mxu0 %v3481_v30  ;;  %v3521_v7 = vld [vmem:[#allocation2 + $0x324] ss:$16 sps:$4 sm:$0xff]   ;;  %v3524_v9 = vld [vmem:[#allocation2 + $0x320] ss:$16 sps:$4 sm:$0xff]  }
  0x52   :  { %1737 = vmatpush1.bf16.msra.mxu1 %v3482_v31  ;;  %1697 = vmatprep.subr.bf16.mxu0 %v3483_v32  ;;  %v4094_v3 = vcombine.high %v4088_v62, %v4088_v62  ;;  %v3525_v10 = vld [vmem:[#allocation2 + $0x104] ss:$16 sps:$4 sm:$0xff]   ;;  %v3529_v13 = vld [vmem:[#allocation2 + $0x100] ss:$16 sps:$4 sm:$0xff]   ;;  %v4100_v18 = vrot.slane %v360_v12, %v350_v49 }
  0x53   :  { %1738 = vmatprep.subr.bf16.mxu1 %v3485_v33  ;;  %1713 = vmatprep.mubr.bf16.mxu0 %v4088_v62  ;;  %v3527_v11 = vld [vmem:[#allocation2 + $0x304] ss:$16 sps:$4 sm:$0xff]   ;;  %v3530_v15 = vld [vmem:[#allocation2 + $0x300] ss:$16 sps:$4 sm:$0xff]  }
  0x54   :  { %1754 = vmatprep.mubr.bf16.mxu1 %v4094_v3  ;;  %v3533_v16 = vld [vmem:[#allocation2 + $0x4e4] ss:$16 sps:$4 sm:$0xff]   ;;  %v3531_v20 = vld [vmem:[#allocation2 + $0x4e0] ss:$16 sps:$4 sm:$0xff]   ;;  %v4108_v24 = vcombine.high %v4100_v18, %v4100_v18 }
  0x55   :  { %1698 = vmatpush2.bf16.msra.mxu0 %v3487_v34  ;;  %v3536_v17 = vld [vmem:[#allocation2 + $0x6e4] ss:$16 sps:$4 sm:$0xff]   ;;  %v3534_v21 = vld [vmem:[#allocation2 + $0x6e0] ss:$16 sps:$4 sm:$0xff]  }
  0x56   :  { %1739 = vmatpush2.bf16.msra.mxu1 %v3488_v35  ;;  %1699 = vmatprep.subr.bf16.mxu0 %v3489_v39  ;;  %v3539_v22 = vld [vmem:[#allocation2 + $0x4c4] ss:$16 sps:$4 sm:$0xff]   ;;  %v3537_v25 = vld [vmem:[#allocation2 + $0x4c0] ss:$16 sps:$4 sm:$0xff]  }
  0x57   :  { %1740 = vmatprep.subr.bf16.mxu1 %v3491_v40  ;;  %v3542_v23 = vld [vmem:[#allocation2 + $0x6c4] ss:$16 sps:$4 sm:$0xff]   ;;  %v3540_v26 = vld [vmem:[#allocation2 + $0x6c0] ss:$16 sps:$4 sm:$0xff]  }
  0x58   :  { %v3545_v27 = vld [vmem:[#allocation2 + $0x4a4] ss:$16 sps:$4 sm:$0xff]   ;;  %v3543_v29 = vld [vmem:[#allocation2 + $0x4a0] ss:$16 sps:$4 sm:$0xff]  }
  0x59   :  { %1700 = vmatpush2.bf16.msra.mxu0 %v3493_v41  ;;  %v3548_v28 = vld [vmem:[#allocation2 + $0x6a4] ss:$16 sps:$4 sm:$0xff]   ;;  %v3546_v30 = vld [vmem:[#allocation2 + $0x6a0] ss:$16 sps:$4 sm:$0xff]  }
  0x5a   :  { %1741 = vmatpush2.bf16.msra.mxu1 %v3494_v44  ;;  %1701 = vmatprep.subr.bf16.mxu0 %v3495_v45  ;;  %v3551_v31 = vld [vmem:[#allocation2 + $0x484] ss:$16 sps:$4 sm:$0xff]   ;;  %v3549_v33 = vld [vmem:[#allocation2 + $0x480] ss:$16 sps:$4 sm:$0xff]  }
  0x5b   :  { %1742 = vmatprep.subr.bf16.mxu1 %v3497_v46  ;;  %v3554_v32 = vld [vmem:[#allocation2 + $0x684] ss:$16 sps:$4 sm:$0xff]   ;;  %v3552_v34 = vld [vmem:[#allocation2 + $0x680] ss:$16 sps:$4 sm:$0xff]  }
  0x5c   :  { %v3557_v35 = vld [vmem:[#allocation2 + $0x464] ss:$16 sps:$4 sm:$0xff]   ;;  %v3555_v37 = vld [vmem:[#allocation2 + $0x460] ss:$16 sps:$4 sm:$0xff]  }
  0x5d   :  { %1702 = vmatpush2.bf16.msra.mxu0 %v3499_v47  ;;  %v3560_v36 = vld [vmem:[#allocation2 + $0x664] ss:$16 sps:$4 sm:$0xff]   ;;  %v3558_v38 = vld [vmem:[#allocation2 + $0x660] ss:$16 sps:$4 sm:$0xff]  }
  0x5e   :  { %1743 = vmatpush2.bf16.msra.mxu1 %v3500_v48  ;;  %1703 = vmatprep.subr.bf16.mxu0 %v3501_v50  ;;  %v3563_v39 = vld [vmem:[#allocation2 + $0x444] ss:$16 sps:$4 sm:$0xff]   ;;  %v3561_v41 = vld [vmem:[#allocation2 + $0x440] ss:$16 sps:$4 sm:$0xff]  }
  0x5f   :  { %1744 = vmatprep.subr.bf16.mxu1 %v3503_v51  ;;  %v3566_v40 = vld [vmem:[#allocation2 + $0x644] ss:$16 sps:$4 sm:$0xff]   ;;  %v3564_v42 = vld [vmem:[#allocation2 + $0x640] ss:$16 sps:$4 sm:$0xff]  }
  0x60   :  { %v3569_v44 = vld [vmem:[#allocation2 + $0x424] ss:$16 sps:$4 sm:$0xff]   ;;  %v3567_v46 = vld [vmem:[#allocation2 + $0x420] ss:$16 sps:$4 sm:$0xff]  }
  0x61   :  { %1704 = vmatpush2.bf16.msra.mxu0 %v3505_v53  ;;  %v3572_v45 = vld [vmem:[#allocation2 + $0x624] ss:$16 sps:$4 sm:$0xff]   ;;  %v3570_v47 = vld [vmem:[#allocation2 + $0x620] ss:$16 sps:$4 sm:$0xff]  }
  0x62   :  { %1745 = vmatpush2.bf16.msra.mxu1 %v3506_v56  ;;  %1705 = vmatprep.subr.bf16.mxu0 %v3507_v57  ;;  %v3575_v48 = vld [vmem:[#allocation2 + $0x404] ss:$16 sps:$4 sm:$0xff]   ;;  %v3573_v50 = vld [vmem:[#allocation2 + $0x400] ss:$16 sps:$4 sm:$0xff]  }
  0x63   :  { %1746 = vmatprep.subr.bf16.mxu1 %v3509_v58  ;;  %v3578_v49 = vld [vmem:[#allocation2 + $0x604] ss:$16 sps:$4 sm:$0xff]   ;;  %v3576_v51 = vld [vmem:[#allocation2 + $0x600] ss:$16 sps:$4 sm:$0xff]  }
  0x64   :  { %v3581_v52 = vld [vmem:[#allocation2 + $0x5e4] ss:$16 sps:$4 sm:$0xff]   ;;  %v3579_v54 = vld [vmem:[#allocation2 + $0x5e0] ss:$16 sps:$4 sm:$0xff]  }
  0x65   :  { %1706 = vmatpush2.bf16.msra.mxu0 %v3511_v61  ;;  %v3584_v53 = vld [vmem:[#allocation2 + $0x7e4] ss:$16 sps:$4 sm:$0xff]   ;;  %v3582_v55 = vld [vmem:[#allocation2 + $0x7e0] ss:$16 sps:$4 sm:$0xff]  }
  0x66   :  { %1747 = vmatpush2.bf16.msra.mxu1 %v3512_v0  ;;  %1707 = vmatprep.subr.bf16.mxu0 %v3513_v1  ;;  %v3587_v56 = vld [vmem:[#allocation2 + $0x5c4] ss:$16 sps:$4 sm:$0xff]   ;;  %v3585_v58 = vld [vmem:[#allocation2 + $0x5c0] ss:$16 sps:$4 sm:$0xff]  }
  0x67   :  { %1748 = vmatprep.subr.bf16.mxu1 %v3515_v2  ;;  %v3590_v57 = vld [vmem:[#allocation2 + $0x7c4] ss:$16 sps:$4 sm:$0xff]   ;;  %v3588_v59 = vld [vmem:[#allocation2 + $0x7c0] ss:$16 sps:$4 sm:$0xff]  }
  0x68   :  { %v3593_v60 = vld [vmem:[#allocation2 + $0x5a4] ss:$16 sps:$4 sm:$0xff]   ;;  %v3591_v0 = vld [vmem:[#allocation2 + $0x5a0] ss:$16 sps:$4 sm:$0xff]  }
  0x69   :  { %1708 = vmatpush2.bf16.msra.mxu0 %v3517_v4  ;;  %v3596_v61 = vld [vmem:[#allocation2 + $0x7a4] ss:$16 sps:$4 sm:$0xff]   ;;  %v3594_v1 = vld [vmem:[#allocation2 + $0x7a0] ss:$16 sps:$4 sm:$0xff]  }
  0x6a   :  { %1749 = vmatpush2.bf16.msra.mxu1 %v3518_v5  ;;  %1709 = vmatprep.subr.bf16.mxu0 %v3519_v6  ;;  %v3599_v2 = vld [vmem:[#allocation2 + $0x584] ss:$16 sps:$4 sm:$0xff]   ;;  %v3597_v5 = vld [vmem:[#allocation2 + $0x580] ss:$16 sps:$4 sm:$0xff]  }
  0x6b   :  { %1750 = vmatprep.subr.bf16.mxu1 %v3521_v7  ;;  %v3602_v4 = vld [vmem:[#allocation2 + $0x784] ss:$16 sps:$4 sm:$0xff]   ;;  %v3600_v6 = vld [vmem:[#allocation2 + $0x780] ss:$16 sps:$4 sm:$0xff]  }
  0x6c   :  { %v3605_v7 = vld [vmem:[#allocation2 + $0x564] ss:$16 sps:$4 sm:$0xff]  }
  0x6d   :  { %1710 = vmatpush2.bf16.msra.mxu0 %v3523_v8  ;;  %v3608_v8 = vld [vmem:[#allocation2 + $0x764] ss:$16 sps:$4 sm:$0xff]  }
  0x6e   :  { %1751 = vmatpush2.bf16.msra.mxu1 %v3524_v9  ;;  %1711 = vmatprep.subr.bf16.mxu0 %v3525_v10  ;;  %v3603_v9 = vld [vmem:[#allocation2 + $0x560] ss:$16 sps:$4 sm:$0xff]   ;;  %v3614_v12 = vld [vmem:[#allocation2 + $0x744] ss:$16 sps:$4 sm:$0xff]  }
  0x6f   :  { %1752 = vmatprep.subr.bf16.mxu1 %v3527_v11  ;;  %v3606_v10 = vld [vmem:[#allocation2 + $0x760] ss:$16 sps:$4 sm:$0xff]   ;;  %v3611_v11 = vld [vmem:[#allocation2 + $0x544] ss:$16 sps:$4 sm:$0xff]  }
  0x71   :  { %1712 = vmatpush2.bf16.msra.mxu0 %v3529_v13  ;;  %v3609_v13 = vld [vmem:[#allocation2 + $0x540] ss:$16 sps:$4 sm:$0xff]  }
  0x72   :  { %1753 = vmatpush2.bf16.msra.mxu1 %v3530_v15  ;;  %1763 = vmatprep.subr.bf16.mxu0 %v3533_v16  ;;  %v3612_v15 = vld [vmem:[#allocation2 + $0x740] ss:$16 sps:$4 sm:$0xff]   ;;  %v3617_v16 = vld [vmem:[#allocation2 + $0x524] ss:$16 sps:$4 sm:$0xff]  }
  0x73   :  { %1804 = vmatprep.subr.bf16.mxu1 %v3536_v17  ;;  %v3620_v17 = vld [vmem:[#allocation2 + $0x724] ss:$16 sps:$4 sm:$0xff]  }
  0x74   :  { %1714 = vmatmul.mubr.bf16.vlgmr.msra.gmra.mxu0 %v4098_v14 }
  0x75   :  { %1755 = vmatmul.mubr.bf16.vlgmr.msra.gmra.mxu1 %v4104_v19  ;;  %1764 = vmatpush1.bf16.msra.mxu0 %v3531_v20  ;;  %v3615_v20 = vld [vmem:[#allocation2 + $0x520] ss:$16 sps:$4 sm:$0xff]  }
  0x76   :  { %1805 = vmatpush1.bf16.msra.mxu1 %v3534_v21  ;;  %1765 = vmatprep.subr.bf16.mxu0 %v3539_v22  ;;  %v3618_v21 = vld [vmem:[#allocation2 + $0x720] ss:$16 sps:$4 sm:$0xff]   ;;  %v3623_v22 = vld [vmem:[#allocation2 + $0x504] ss:$16 sps:$4 sm:$0xff]  }
  0x77   :  { %1806 = vmatprep.subr.bf16.mxu1 %v3542_v23  ;;  %1795 = vmatprep.mubr.bf16.mxu0 %v4100_v18  ;;  %v3626_v23 = vld [vmem:[#allocation2 + $0x704] ss:$16 sps:$4 sm:$0xff]  }
  0x78   :  { %1836 = vmatprep.mubr.bf16.mxu1 %v4108_v24 }
  0x79   :  { %1766 = vmatpush1.bf16.msra.mxu0 %v3537_v25  ;;  %v3621_v25 = vld [vmem:[#allocation2 + $0x500] ss:$16 sps:$4 sm:$0xff]  }
  0x7a   :  { %1807 = vmatpush1.bf16.msra.mxu1 %v3540_v26  ;;  %1767 = vmatprep.subr.bf16.mxu0 %v3545_v27  ;;  %v3624_v26 = vld [vmem:[#allocation2 + $0x700] ss:$16 sps:$4 sm:$0xff]   ;;  %v3630_v27 = vld [vmem:[#allocation2 + $0xec] ss:$16 sps:$4 sm:$0xff]  }
  0x7b   :  { %1808 = vmatprep.subr.bf16.mxu1 %v3548_v28  ;;  %v3633_v28 = vld [vmem:[#allocation2 + $0x2ec] ss:$16 sps:$4 sm:$0xff]  }
  0x7d   :  { %1768 = vmatpush1.bf16.msra.mxu0 %v3543_v29  ;;  %v4116_v29 = vcombine.high %v4090_v63, %v4090_v63 }
  0x7e   :  { %1809 = vmatpush1.bf16.msra.mxu1 %v3546_v30  ;;  %1769 = vmatprep.subr.bf16.mxu0 %v3551_v31  ;;  %v3628_v30 = vld [vmem:[#allocation2 + $0xe8] ss:$16 sps:$4 sm:$0xff]  }
  0x7f   :  { %1810 = vmatprep.subr.bf16.mxu1 %v3554_v32  ;;  %v3631_v31 = vld [vmem:[#allocation2 + $0x2e8] ss:$16 sps:$4 sm:$0xff]   ;;  %v3636_v32 = vld [vmem:[#allocation2 + $0xcc] ss:$16 sps:$4 sm:$0xff]  }
  0x81   :  { %1770 = vmatpush1.bf16.msra.mxu0 %v3549_v33  ;;  %v3639_v33 = vld [vmem:[#allocation2 + $0x2cc] ss:$16 sps:$4 sm:$0xff]  }
  0x82   :  { %1811 = vmatpush1.bf16.msra.mxu1 %v3552_v34  ;;  %1771 = vmatprep.subr.bf16.mxu0 %v3557_v35  ;;  %v3634_v34 = vld [vmem:[#allocation2 + $0xc8] ss:$16 sps:$4 sm:$0xff]  }
  0x83   :  { %1812 = vmatprep.subr.bf16.mxu1 %v3560_v36  ;;  %v3637_v35 = vld [vmem:[#allocation2 + $0x2c8] ss:$16 sps:$4 sm:$0xff]   ;;  %v3642_v36 = vld [vmem:[#allocation2 + $0xac] ss:$16 sps:$4 sm:$0xff]  }
  0x85   :  { %1772 = vmatpush1.bf16.msra.mxu0 %v3555_v37  ;;  %v3645_v37 = vld [vmem:[#allocation2 + $0x2ac] ss:$16 sps:$4 sm:$0xff]  }
  0x86   :  { %1813 = vmatpush1.bf16.msra.mxu1 %v3558_v38  ;;  %1773 = vmatprep.subr.bf16.mxu0 %v3563_v39  ;;  %v3640_v38 = vld [vmem:[#allocation2 + $0xa8] ss:$16 sps:$4 sm:$0xff]  }
  0x87   :  { %1814 = vmatprep.subr.bf16.mxu1 %v3566_v40  ;;  %v3643_v39 = vld [vmem:[#allocation2 + $0x2a8] ss:$16 sps:$4 sm:$0xff]   ;;  %v3648_v40 = vld [vmem:[#allocation2 + $0x8c] ss:$16 sps:$4 sm:$0xff]  }
  0x89   :  { %1774 = vmatpush1.bf16.msra.mxu0 %v3561_v41  ;;  %v3651_v41 = vld [vmem:[#allocation2 + $0x28c] ss:$16 sps:$4 sm:$0xff]  }
  0x8a   :  { %1815 = vmatpush1.bf16.msra.mxu1 %v3564_v42  ;;  %1775 = vmatprep.subr.bf16.mxu0 %v3569_v44  ;;  %v3646_v42 = vld [vmem:[#allocation2 + $0x88] ss:$16 sps:$4 sm:$0xff]  }
  0x8b   :  { %1816 = vmatprep.subr.bf16.mxu1 %v3572_v45  ;;  %v3649_v44 = vld [vmem:[#allocation2 + $0x288] ss:$16 sps:$4 sm:$0xff]   ;;  %v3654_v45 = vld [vmem:[#allocation2 + $0x6c] ss:$16 sps:$4 sm:$0xff]  }
  0x8d   :  { %1776 = vmatpush1.bf16.msra.mxu0 %v3567_v46  ;;  %v3657_v46 = vld [vmem:[#allocation2 + $0x26c] ss:$16 sps:$4 sm:$0xff]  }
  0x8e   :  { %1817 = vmatpush1.bf16.msra.mxu1 %v3570_v47  ;;  %1777 = vmatprep.subr.bf16.mxu0 %v3575_v48  ;;  %v3652_v47 = vld [vmem:[#allocation2 + $0x68] ss:$16 sps:$4 sm:$0xff]   ;;  %v3663_v48 = vld [vmem:[#allocation2 + $0x24c] ss:$16 sps:$4 sm:$0xff]  }
  0x8f   :  { %1818 = vmatprep.subr.bf16.mxu1 %v3578_v49  ;;  %v3658_v49 = vld [vmem:[#allocation2 + $0x48] ss:$16 sps:$4 sm:$0xff]  }
  0x91   :  { %1778 = vmatpush1.bf16.msra.mxu0 %v3573_v50  ;;  %v3661_v50 = vld [vmem:[#allocation2 + $0x248] ss:$16 sps:$4 sm:$0xff]  }
  0x92   :  { %1819 = vmatpush1.bf16.msra.mxu1 %v3576_v51  ;;  %1779 = vmatprep.subr.bf16.mxu0 %v3581_v52  ;;  %v3666_v51 = vld [vmem:[#allocation2 + $0x2c] ss:$16 sps:$4 sm:$0xff]  }
  0x93   :  { %1820 = vmatprep.subr.bf16.mxu1 %v3584_v53  ;;  %v3669_v52 = vld [vmem:[#allocation2 + $0x22c] ss:$16 sps:$4 sm:$0xff]   ;;  %v3664_v53 = vld [vmem:[#allocation2 + $0x28] ss:$16 sps:$4 sm:$0xff]  }
  0x95   :  { %1780 = vmatpush2.bf16.msra.mxu0 %v3579_v54  ;;  %v3667_v54 = vld [vmem:[#allocation2 + $0x228] ss:$16 sps:$4 sm:$0xff]  }
  0x96   :  { %1821 = vmatpush2.bf16.msra.mxu1 %v3582_v55  ;;  %1781 = vmatprep.subr.bf16.mxu0 %v3587_v56  ;;  %v3672_v55 = vld [vmem:[#allocation2 + $0xc] ss:$16 sps:$4 sm:$0xff]  }
  0x97   :  { %1822 = vmatprep.subr.bf16.mxu1 %v3590_v57  ;;  %v3675_v56 = vld [vmem:[#allocation2 + $0x20c] ss:$16 sps:$4 sm:$0xff]   ;;  %v3670_v57 = vld [vmem:[#allocation2 + $0x8] ss:$16 sps:$4 sm:$0xff]  }
  0x99   :  { %1782 = vmatpush2.bf16.msra.mxu0 %v3585_v58  ;;  %v3673_v58 = vld [vmem:[#allocation2 + $0x208] ss:$16 sps:$4 sm:$0xff]  }
  0x9a   :  { %1823 = vmatpush2.bf16.msra.mxu1 %v3588_v59  ;;  %1783 = vmatprep.subr.bf16.mxu0 %v3593_v60  ;;  %v3678_v59 = vld [vmem:[#allocation2 + $0x1ec] ss:$16 sps:$4 sm:$0xff]  }
  0x9b   :  { %1824 = vmatprep.subr.bf16.mxu1 %v3596_v61  ;;  %v3681_v60 = vld [vmem:[#allocation2 + $0x3ec] ss:$16 sps:$4 sm:$0xff]   ;;  %v3676_v61 = vld [vmem:[#allocation2 + $0x1e8] ss:$16 sps:$4 sm:$0xff]  }
  0x9d   :  { %1784 = vmatpush2.bf16.msra.mxu0 %v3591_v0  ;;  %v3679_v0 = vld [vmem:[#allocation2 + $0x3e8] ss:$16 sps:$4 sm:$0xff]  }
  0x9e   :  { %1825 = vmatpush2.bf16.msra.mxu1 %v3594_v1  ;;  %1785 = vmatprep.subr.bf16.mxu0 %v3599_v2  ;;  %v3684_v1 = vld [vmem:[#allocation2 + $0x1cc] ss:$16 sps:$4 sm:$0xff]  }
  0x9f   :  { %1826 = vmatprep.subr.bf16.mxu1 %v3602_v4  ;;  %v3687_v2 = vld [vmem:[#allocation2 + $0x3cc] ss:$16 sps:$4 sm:$0xff]   ;;  %v3682_v4 = vld [vmem:[#allocation2 + $0x1c8] ss:$16 sps:$4 sm:$0xff]  }
  0xa1   :  { %1786 = vmatpush2.bf16.msra.mxu0 %v3597_v5  ;;  %v3685_v5 = vld [vmem:[#allocation2 + $0x3c8] ss:$16 sps:$4 sm:$0xff]  }
  0xa2   :  { %1827 = vmatpush2.bf16.msra.mxu1 %v3600_v6  ;;  %1787 = vmatprep.subr.bf16.mxu0 %v3605_v7  ;;  %v3690_v6 = vld [vmem:[#allocation2 + $0x1ac] ss:$16 sps:$4 sm:$0xff]  }
  0xa3   :  { %1828 = vmatprep.subr.bf16.mxu1 %v3608_v8  ;;  %v3693_v7 = vld [vmem:[#allocation2 + $0x3ac] ss:$16 sps:$4 sm:$0xff]   ;;  %v3688_v8 = vld [vmem:[#allocation2 + $0x1a8] ss:$16 sps:$4 sm:$0xff]  }
  0xa5   :  { %1788 = vmatpush2.bf16.msra.mxu0 %v3603_v9  ;;  %v3691_v9 = vld [vmem:[#allocation2 + $0x3a8] ss:$16 sps:$4 sm:$0xff]  }
  0xa6   :  { %1829 = vmatpush2.bf16.msra.mxu1 %v3606_v10  ;;  %1789 = vmatprep.subr.bf16.mxu0 %v3611_v11  ;;  %v3696_v10 = vld [vmem:[#allocation2 + $0x18c] ss:$16 sps:$4 sm:$0xff]  }
  0xa7   :  { %1830 = vmatprep.subr.bf16.mxu1 %v3614_v12  ;;  %v3699_v11 = vld [vmem:[#allocation2 + $0x38c] ss:$16 sps:$4 sm:$0xff]   ;;  %v3694_v12 = vld [vmem:[#allocation2 + $0x188] ss:$16 sps:$4 sm:$0xff]  }
  0xa9   :  { %1790 = vmatpush2.bf16.msra.mxu0 %v3609_v13  ;;  %v3697_v13 = vld [vmem:[#allocation2 + $0x388] ss:$16 sps:$4 sm:$0xff]  }
  0xaa   :  { %1831 = vmatpush2.bf16.msra.mxu1 %v3612_v15  ;;  %1791 = vmatprep.subr.bf16.mxu0 %v3617_v16  ;;  %v3702_v15 = vld [vmem:[#allocation2 + $0x16c] ss:$16 sps:$4 sm:$0xff]  }
  0xab   :  { %1832 = vmatprep.subr.bf16.mxu1 %v3620_v17  ;;  %v3705_v16 = vld [vmem:[#allocation2 + $0x36c] ss:$16 sps:$4 sm:$0xff]   ;;  %v3700_v17 = vld [vmem:[#allocation2 + $0x168] ss:$16 sps:$4 sm:$0xff]  }
  0xad   :  { %1792 = vmatpush2.bf16.msra.mxu0 %v3615_v20  ;;  %v3703_v20 = vld [vmem:[#allocation2 + $0x368] ss:$16 sps:$4 sm:$0xff]  }
  0xae   :  { %1833 = vmatpush2.bf16.msra.mxu1 %v3618_v21  ;;  %1793 = vmatprep.subr.bf16.mxu0 %v3623_v22  ;;  %v3708_v21 = vld [vmem:[#allocation2 + $0x14c] ss:$16 sps:$4 sm:$0xff]  }
  0xaf   :  { %1834 = vmatprep.subr.bf16.mxu1 %v3626_v23  ;;  %v3711_v22 = vld [vmem:[#allocation2 + $0x34c] ss:$16 sps:$4 sm:$0xff]   ;;  %v3706_v23 = vld [vmem:[#allocation2 + $0x148] ss:$16 sps:$4 sm:$0xff]  }
  0xb1   :  { %1794 = vmatpush2.bf16.msra.mxu0 %v3621_v25  ;;  %v3709_v25 = vld [vmem:[#allocation2 + $0x348] ss:$16 sps:$4 sm:$0xff]  }
  0xb2   :  { %1835 = vmatpush2.bf16.msra.mxu1 %v3624_v26  ;;  %1845 = vmatprep.subr.bf16.mxu0 %v3630_v27  ;;  %v3714_v26 = vld [vmem:[#allocation2 + $0x12c] ss:$16 sps:$4 sm:$0xff]  }
  0xb3   :  { %1886 = vmatprep.subr.bf16.mxu1 %v3633_v28  ;;  %v3717_v27 = vld [vmem:[#allocation2 + $0x32c] ss:$16 sps:$4 sm:$0xff]   ;;  %v3712_v28 = vld [vmem:[#allocation2 + $0x128] ss:$16 sps:$4 sm:$0xff]  }
  0xb4   :  { %1796 = vmatmul.mubr.bf16.vlgmr.msra.gmra.mxu0 %v4090_v63 }
  0xb5   :  { %1837 = vmatmul.mubr.bf16.vlgmr.msra.gmra.mxu1 %v4116_v29  ;;  %1846 = vmatpush1.bf16.msra.mxu0 %v3628_v30  ;;  %v3715_v30 = vld [vmem:[#allocation2 + $0x328] ss:$16 sps:$4 sm:$0xff]  }
  0xb6   :  { %1887 = vmatpush1.bf16.msra.mxu1 %v3631_v31  ;;  %1847 = vmatprep.subr.bf16.mxu0 %v3636_v32  ;;  %v3720_v31 = vld [vmem:[#allocation2 + $0x10c] ss:$16 sps:$4 sm:$0xff]  }
  0xb7   :  { %1888 = vmatprep.subr.bf16.mxu1 %v3639_v33  ;;  %1877 = vmatprep.mubr.bf16.mxu0 %v4088_v62  ;;  %v3655_v62 = vld [vmem:[#allocation2 + $0x268] ss:$16 sps:$4 sm:$0xff]   ;;  %v3723_v32 = vld [vmem:[#allocation2 + $0x30c] ss:$16 sps:$4 sm:$0xff]  }
  0xb8   :  { %1918 = vmatprep.mubr.bf16.mxu1 %v4094_v3  ;;  %v3660_v3 = vld [vmem:[#allocation2 + $0x4c] ss:$16 sps:$4 sm:$0xff]   ;;  %v3718_v33 = vld [vmem:[#allocation2 + $0x108] ss:$16 sps:$4 sm:$0xff]  }
  0xb9   :  { %1848 = vmatpush1.bf16.msra.mxu0 %v3634_v34  ;;  %v3721_v34 = vld [vmem:[#allocation2 + $0x308] ss:$16 sps:$4 sm:$0xff]  }
  0xba   :  { %1889 = vmatpush1.bf16.msra.mxu1 %v3637_v35  ;;  %1849 = vmatprep.subr.bf16.mxu0 %v3642_v36  ;;  %v3726_v35 = vld [vmem:[#allocation2 + $0x4ec] ss:$16 sps:$4 sm:$0xff]  }
  0xbb   :  { %1890 = vmatprep.subr.bf16.mxu1 %v3645_v37  ;;  %v3729_v36 = vld [vmem:[#allocation2 + $0x6ec] ss:$16 sps:$4 sm:$0xff]   ;;  %v3724_v37 = vld [vmem:[#allocation2 + $0x4e8] ss:$16 sps:$4 sm:$0xff]  }
  0xbd   :  { %1850 = vmatpush1.bf16.msra.mxu0 %v3640_v38  ;;  %v3727_v38 = vld [vmem:[#allocation2 + $0x6e8] ss:$16 sps:$4 sm:$0xff]  }
  0xbe   :  { %1891 = vmatpush1.bf16.msra.mxu1 %v3643_v39  ;;  %1851 = vmatprep.subr.bf16.mxu0 %v3648_v40  ;;  %v3732_v39 = vld [vmem:[#allocation2 + $0x4cc] ss:$16 sps:$4 sm:$0xff]  }
  0xbf   :  { %1892 = vmatprep.subr.bf16.mxu1 %v3651_v41  ;;  %v3735_v40 = vld [vmem:[#allocation2 + $0x6cc] ss:$16 sps:$4 sm:$0xff]   ;;  %v3730_v41 = vld [vmem:[#allocation2 + $0x4c8] ss:$16 sps:$4 sm:$0xff]  }
  0xc1   :  { %1852 = vmatpush1.bf16.msra.mxu0 %v3646_v42  ;;  %v3733_v42 = vld [vmem:[#allocation2 + $0x6c8] ss:$16 sps:$4 sm:$0xff]  }
  0xc2   :  { %1893 = vmatpush1.bf16.msra.mxu1 %v3649_v44  ;;  %1853 = vmatprep.subr.bf16.mxu0 %v3654_v45  ;;  %v3738_v44 = vld [vmem:[#allocation2 + $0x4ac] ss:$16 sps:$4 sm:$0xff]  }
  0xc3   :  { %1894 = vmatprep.subr.bf16.mxu1 %v3657_v46  ;;  %v3741_v45 = vld [vmem:[#allocation2 + $0x6ac] ss:$16 sps:$4 sm:$0xff]   ;;  %v3736_v46 = vld [vmem:[#allocation2 + $0x4a8] ss:$16 sps:$4 sm:$0xff]  }
  0xc5   :  { %1854 = vmatpush1.bf16.msra.mxu0 %v3652_v47  ;;  %v3739_v47 = vld [vmem:[#allocation2 + $0x6a8] ss:$16 sps:$4 sm:$0xff]  }
  0xc6   :  { %1895 = vmatpush1.bf16.msra.mxu1 %v3655_v62  ;;  %1855 = vmatprep.subr.bf16.mxu0 %v3660_v3  ;;  %v3744_v62 = vld [vmem:[#allocation2 + $0x48c] ss:$16 sps:$4 sm:$0xff]  }
  0xc7   :  { %1896 = vmatprep.subr.bf16.mxu1 %v3663_v48  ;;  %v3747_v3 = vld [vmem:[#allocation2 + $0x68c] ss:$16 sps:$4 sm:$0xff]  }
  0xc8   :  { %v3750_v48 = vld [vmem:[#allocation2 + $0x46c] ss:$16 sps:$4 sm:$0xff]  }
  0xc9   :  { %1856 = vmatpush1.bf16.msra.mxu0 %v3658_v49  ;;  %v3753_v49 = vld [vmem:[#allocation2 + $0x66c] ss:$16 sps:$4 sm:$0xff]  }
  0xca   :  { %1897 = vmatpush1.bf16.msra.mxu1 %v3661_v50  ;;  %1857 = vmatprep.subr.bf16.mxu0 %v3666_v51  ;;  %v3748_v50 = vld [vmem:[#allocation2 + $0x468] ss:$16 sps:$4 sm:$0xff]   ;;  %v3759_v51 = vld [vmem:[#allocation2 + $0x64c] ss:$16 sps:$4 sm:$0xff]  }
  0xcb   :  { %1898 = vmatprep.subr.bf16.mxu1 %v3669_v52  ;;  %v3754_v52 = vld [vmem:[#allocation2 + $0x448] ss:$16 sps:$4 sm:$0xff]  }
  0xcd   :  { %1858 = vmatpush1.bf16.msra.mxu0 %v3664_v53  ;;  %v3757_v53 = vld [vmem:[#allocation2 + $0x648] ss:$16 sps:$4 sm:$0xff]  }
  0xce   :  { %1899 = vmatpush1.bf16.msra.mxu1 %v3667_v54  ;;  %1859 = vmatprep.subr.bf16.mxu0 %v3672_v55  ;;  %v3762_v54 = vld [vmem:[#allocation2 + $0x42c] ss:$16 sps:$4 sm:$0xff]  }
  0xcf   :  { %1900 = vmatprep.subr.bf16.mxu1 %v3675_v56  ;;  %v3765_v55 = vld [vmem:[#allocation2 + $0x62c] ss:$16 sps:$4 sm:$0xff]   ;;  %v3760_v56 = vld [vmem:[#allocation2 + $0x428] ss:$16 sps:$4 sm:$0xff]  }
  0xd1   :  { %1860 = vmatpush1.bf16.msra.mxu0 %v3670_v57  ;;  %v3763_v57 = vld [vmem:[#allocation2 + $0x628] ss:$16 sps:$4 sm:$0xff]  }
  0xd2   :  { %1901 = vmatpush1.bf16.msra.mxu1 %v3673_v58  ;;  %1861 = vmatprep.subr.bf16.mxu0 %v3678_v59  ;;  %v3768_v58 = vld [vmem:[#allocation2 + $0x40c] ss:$16 sps:$4 sm:$0xff]  }
  0xd3   :  { %1902 = vmatprep.subr.bf16.mxu1 %v3681_v60  ;;  %v3771_v59 = vld [vmem:[#allocation2 + $0x60c] ss:$16 sps:$4 sm:$0xff]   ;;  %v3766_v60 = vld [vmem:[#allocation2 + $0x408] ss:$16 sps:$4 sm:$0xff]  }
  0xd5   :  { %1862 = vmatpush2.bf16.msra.mxu0 %v3676_v61  ;;  %v3769_v61 = vld [vmem:[#allocation2 + $0x608] ss:$16 sps:$4 sm:$0xff]  }
  0xd6   :  { %1903 = vmatpush2.bf16.msra.mxu1 %v3679_v0  ;;  %1863 = vmatprep.subr.bf16.mxu0 %v3684_v1  ;;  %v3774_v0 = vld [vmem:[#allocation2 + $0x5ec] ss:$16 sps:$4 sm:$0xff]  }
  0xd7   :  { %1904 = vmatprep.subr.bf16.mxu1 %v3687_v2  ;;  %v3777_v1 = vld [vmem:[#allocation2 + $0x7ec] ss:$16 sps:$4 sm:$0xff]   ;;  %v3772_v2 = vld [vmem:[#allocation2 + $0x5e8] ss:$16 sps:$4 sm:$0xff]  }
  0xd9   :  { %1864 = vmatpush2.bf16.msra.mxu0 %v3682_v4  ;;  %v3775_v4 = vld [vmem:[#allocation2 + $0x7e8] ss:$16 sps:$4 sm:$0xff]  }
  0xda   :  { %1905 = vmatpush2.bf16.msra.mxu1 %v3685_v5  ;;  %1865 = vmatprep.subr.bf16.mxu0 %v3690_v6  ;;  %v3780_v5 = vld [vmem:[#allocation2 + $0x5cc] ss:$16 sps:$4 sm:$0xff]  }
  0xdb   :  { %1906 = vmatprep.subr.bf16.mxu1 %v3693_v7  ;;  %v3783_v6 = vld [vmem:[#allocation2 + $0x7cc] ss:$16 sps:$4 sm:$0xff]   ;;  %v3778_v7 = vld [vmem:[#allocation2 + $0x5c8] ss:$16 sps:$4 sm:$0xff]  }
  0xdd   :  { %1866 = vmatpush2.bf16.msra.mxu0 %v3688_v8  ;;  %v3781_v8 = vld [vmem:[#allocation2 + $0x7c8] ss:$16 sps:$4 sm:$0xff]  }
  0xde   :  { %1907 = vmatpush2.bf16.msra.mxu1 %v3691_v9  ;;  %1867 = vmatprep.subr.bf16.mxu0 %v3696_v10  ;;  %v3786_v9 = vld [vmem:[#allocation2 + $0x5ac] ss:$16 sps:$4 sm:$0xff]  }
  0xdf   :  { %1908 = vmatprep.subr.bf16.mxu1 %v3699_v11  ;;  %v3789_v10 = vld [vmem:[#allocation2 + $0x7ac] ss:$16 sps:$4 sm:$0xff]   ;;  %v3784_v11 = vld [vmem:[#allocation2 + $0x5a8] ss:$16 sps:$4 sm:$0xff]  }
  0xe1   :  { %1868 = vmatpush2.bf16.msra.mxu0 %v3694_v12  ;;  %v3787_v12 = vld [vmem:[#allocation2 + $0x7a8] ss:$16 sps:$4 sm:$0xff]  }
  0xe2   :  { %1909 = vmatpush2.bf16.msra.mxu1 %v3697_v13  ;;  %1869 = vmatprep.subr.bf16.mxu0 %v3702_v15  ;;  %v3792_v13 = vld [vmem:[#allocation2 + $0x58c] ss:$16 sps:$4 sm:$0xff]  }
  0xe3   :  { %1910 = vmatprep.subr.bf16.mxu1 %v3705_v16  ;;  %v3795_v15 = vld [vmem:[#allocation2 + $0x78c] ss:$16 sps:$4 sm:$0xff]   ;;  %v3790_v16 = vld [vmem:[#allocation2 + $0x588] ss:$16 sps:$4 sm:$0xff]  }
  0xe5   :  { %1870 = vmatpush2.bf16.msra.mxu0 %v3700_v17  ;;  %v3793_v17 = vld [vmem:[#allocation2 + $0x788] ss:$16 sps:$4 sm:$0xff]  }
  0xe6   :  { %1911 = vmatpush2.bf16.msra.mxu1 %v3703_v20  ;;  %1871 = vmatprep.subr.bf16.mxu0 %v3708_v21  ;;  %v3798_v20 = vld [vmem:[#allocation2 + $0x56c] ss:$16 sps:$4 sm:$0xff]  }
  0xe7   :  { %1912 = vmatprep.subr.bf16.mxu1 %v3711_v22  ;;  %v3801_v21 = vld [vmem:[#allocation2 + $0x76c] ss:$16 sps:$4 sm:$0xff]   ;;  %v3796_v22 = vld [vmem:[#allocation2 + $0x568] ss:$16 sps:$4 sm:$0xff]  }
  0xe9   :  { %1872 = vmatpush2.bf16.msra.mxu0 %v3706_v23  ;;  %v3799_v23 = vld [vmem:[#allocation2 + $0x768] ss:$16 sps:$4 sm:$0xff]  }
  0xea   :  { %1913 = vmatpush2.bf16.msra.mxu1 %v3709_v25  ;;  %1873 = vmatprep.subr.bf16.mxu0 %v3714_v26  ;;  %v3804_v25 = vld [vmem:[#allocation2 + $0x54c] ss:$16 sps:$4 sm:$0xff]  }
  0xeb   :  { %1914 = vmatprep.subr.bf16.mxu1 %v3717_v27  ;;  %v3807_v26 = vld [vmem:[#allocation2 + $0x74c] ss:$16 sps:$4 sm:$0xff]   ;;  %v3802_v27 = vld [vmem:[#allocation2 + $0x548] ss:$16 sps:$4 sm:$0xff]  }
  0xed   :  { %1874 = vmatpush2.bf16.msra.mxu0 %v3712_v28  ;;  %v3805_v28 = vld [vmem:[#allocation2 + $0x748] ss:$16 sps:$4 sm:$0xff]  }
  0xee   :  { %1915 = vmatpush2.bf16.msra.mxu1 %v3715_v30  ;;  %1875 = vmatprep.subr.bf16.mxu0 %v3720_v31  ;;  %v3810_v30 = vld [vmem:[#allocation2 + $0x52c] ss:$16 sps:$4 sm:$0xff]  }
  0xef   :  { %1916 = vmatprep.subr.bf16.mxu1 %v3723_v32  ;;  %v3813_v31 = vld [vmem:[#allocation2 + $0x72c] ss:$16 sps:$4 sm:$0xff]   ;;  %v3808_v32 = vld [vmem:[#allocation2 + $0x528] ss:$16 sps:$4 sm:$0xff]  }
  0xf1   :  { %1876 = vmatpush2.bf16.msra.mxu0 %v3718_v33  ;;  %v3811_v33 = vld [vmem:[#allocation2 + $0x728] ss:$16 sps:$4 sm:$0xff]  }
  0xf2   :  { %1917 = vmatpush2.bf16.msra.mxu1 %v3721_v34  ;;  %1927 = vmatprep.subr.bf16.mxu0 %v3726_v35  ;;  %v3816_v34 = vld [vmem:[#allocation2 + $0x50c] ss:$16 sps:$4 sm:$0xff]  }
  0xf3   :  { %1968 = vmatprep.subr.bf16.mxu1 %v3729_v36  ;;  %v3819_v35 = vld [vmem:[#allocation2 + $0x70c] ss:$16 sps:$4 sm:$0xff]   ;;  %v3814_v36 = vld [vmem:[#allocation2 + $0x508] ss:$16 sps:$4 sm:$0xff]  }
  0xf4   :  { %1878 = vmatmul.mubr.bf16.vlgmr.msra.gmra.mxu0 %v4098_v14  ;;  %v3742_v14 = vld [vmem:[#allocation2 + $0x488] ss:$16 sps:$4 sm:$0xff]  }
  0xf5   :  { %1919 = vmatmul.mubr.bf16.vlgmr.msra.gmra.mxu1 %v4104_v19  ;;  %1928 = vmatpush1.bf16.msra.mxu0 %v3724_v37  ;;  %v3745_v19 = vld [vmem:[#allocation2 + $0x688] ss:$16 sps:$4 sm:$0xff]  }
  0xf6   :  { %1969 = vmatpush1.bf16.msra.mxu1 %v3727_v38  ;;  %1929 = vmatprep.subr.bf16.mxu0 %v3732_v39  ;;  %v3817_v37 = vld [vmem:[#allocation2 + $0x708] ss:$16 sps:$4 sm:$0xff]   ;;  %v3822_v38 = vld [vmem:[#allocation4 + $0x74] ss:$8 sps:$4 sm:$0xff]  }
  0xf7   :  { %1970 = vmatprep.subr.bf16.mxu1 %v3735_v40  ;;  %1959 = vmatprep.mubr.bf16.mxu0 %v4100_v18  ;;  %v3751_v18 = vld [vmem:[#allocation2 + $0x668] ss:$16 sps:$4 sm:$0xff]   ;;  %v3825_v40 = vld [vmem:[#allocation4 + $0x64] ss:$8 sps:$4 sm:$0xff]  }
  0xf8   :  { %2000 = vmatprep.mubr.bf16.mxu1 %v4108_v24  ;;  %v3756_v24 = vld [vmem:[#allocation2 + $0x44c] ss:$16 sps:$4 sm:$0xff]   ;;  %v3820_v39 = vld [vmem:[#allocation4 + $0x70] ss:$8 sps:$4 sm:$0xff]  }
  0xf9   :  { %1930 = vmatpush1.bf16.msra.mxu0 %v3730_v41 }
  0xfa   :  { %1971 = vmatpush1.bf16.msra.mxu1 %v3733_v42  ;;  %1931 = vmatprep.subr.bf16.mxu0 %v3738_v44 }
  0xfb   :  { %1972 = vmatprep.subr.bf16.mxu1 %v3741_v45  ;;  %v3823_v45 = vld [vmem:[#allocation4 + $0x60] ss:$8 sps:$4 sm:$0xff]  }
  0xfd   :  { %1932 = vmatpush1.bf16.msra.mxu0 %v3736_v46 }
  0xfe   :  { %1973 = vmatpush1.bf16.msra.mxu1 %v3739_v47  ;;  %1933 = vmatprep.subr.bf16.mxu0 %v3744_v62  ;;  %v3828_v62 = vld [vmem:[#allocation4 + $0x54] ss:$8 sps:$4 sm:$0xff]  }
  0xff   :  { %1974 = vmatprep.subr.bf16.mxu1 %v3747_v3 }
 0x101   :  { %1934 = vmatpush1.bf16.msra.mxu0 %v3742_v14 }
 0x102   :  { %1975 = vmatpush1.bf16.msra.mxu1 %v3745_v19  ;;  %1935 = vmatprep.subr.bf16.mxu0 %v3750_v48  ;;  %v3826_v19 = vld [vmem:[#allocation4 + $0x50] ss:$8 sps:$4 sm:$0xff]  }
 0x103   :  { %1976 = vmatprep.subr.bf16.mxu1 %v3753_v49 }
 0x105   :  { %1936 = vmatpush1.bf16.msra.mxu0 %v3748_v50  ;;  %v3868_v50 = vld [vmem:[#allocation4 + $0x170] ss:$8 sps:$4 sm:$0xff]  }
 0x106   :  { %1977 = vmatpush1.bf16.msra.mxu1 %v3751_v18  ;;  %1937 = vmatprep.subr.bf16.mxu0 %v3756_v24  ;;  %v3873_v18 = vld [vmem:[#allocation4 + $0x164] ss:$8 sps:$4 sm:$0xff]   ;;  %v3829_v24 = vld [vmem:[#allocation4 + $0x40] ss:$8 sps:$4 sm:$0xff]  }
 0x107   :  { %1978 = vmatprep.subr.bf16.mxu1 %v3759_v51  ;;  %v3871_v51 = vld [vmem:[#allocation4 + $0x160] ss:$8 sps:$4 sm:$0xff]  }
 0x109   :  { %1938 = vmatpush1.bf16.msra.mxu0 %v3754_v52  ;;  %v3834_v52 = vld [vmem:[#allocation4 + $0x34] ss:$8 sps:$4 sm:$0xff]  }
 0x10a   :  { %1979 = vmatpush1.bf16.msra.mxu1 %v3757_v53  ;;  %1939 = vmatprep.subr.bf16.mxu0 %v3762_v54  ;;  %v3876_v53 = vld [vmem:[#allocation4 + $0x154] ss:$8 sps:$4 sm:$0xff]   ;;  %v3832_v54 = vld [vmem:[#allocation4 + $0x30] ss:$8 sps:$4 sm:$0xff]  }
 0x10b   :  { %1980 = vmatprep.subr.bf16.mxu1 %v3765_v55  ;;  %v3874_v55 = vld [vmem:[#allocation4 + $0x150] ss:$8 sps:$4 sm:$0xff]  }
 0x10d   :  { %1940 = vmatpush1.bf16.msra.mxu0 %v3760_v56  ;;  %v3837_v56 = vld [vmem:[#allocation4 + $0x24] ss:$8 sps:$4 sm:$0xff]  }
 0x10e   :  { %1981 = vmatpush1.bf16.msra.mxu1 %v3763_v57  ;;  %1941 = vmatprep.subr.bf16.mxu0 %v3768_v58  ;;  %v3879_v57 = vld [vmem:[#allocation4 + $0x144] ss:$8 sps:$4 sm:$0xff]   ;;  %v3835_v58 = vld [vmem:[#allocation4 + $0x20] ss:$8 sps:$4 sm:$0xff]  }
 0x10f   :  { %1982 = vmatprep.subr.bf16.mxu1 %v3771_v59  ;;  %v3877_v59 = vld [vmem:[#allocation4 + $0x140] ss:$8 sps:$4 sm:$0xff]  }
 0x111   :  { %1942 = vmatpush1.bf16.msra.mxu0 %v3766_v60  ;;  %v3840_v60 = vld [vmem:[#allocation4 + $0x14] ss:$8 sps:$4 sm:$0xff]  }
 0x112   :  { %1983 = vmatpush1.bf16.msra.mxu1 %v3769_v61  ;;  %1943 = vmatprep.subr.bf16.mxu0 %v3774_v0  ;;  %v3882_v61 = vld [vmem:[#allocation4 + $0x134] ss:$8 sps:$4 sm:$0xff]   ;;  %v3838_v0 = vld [vmem:[#allocation4 + $0x10] ss:$8 sps:$4 sm:$0xff]  }
 0x113   :  { %1984 = vmatprep.subr.bf16.mxu1 %v3777_v1  ;;  %v3880_v1 = vld [vmem:[#allocation4 + $0x130] ss:$8 sps:$4 sm:$0xff]  }
 0x115   :  { %1944 = vmatpush2.bf16.msra.mxu0 %v3772_v2  ;;  %v3843_v2 = vld [vmem:[#allocation4 + $0x4] ss:$8 sps:$4 sm:$0xff]  }
 0x116   :  { %1985 = vmatpush2.bf16.msra.mxu1 %v3775_v4  ;;  %1945 = vmatprep.subr.bf16.mxu0 %v3780_v5  ;;  %v3885_v4 = vld [vmem:[#allocation4 + $0x124] ss:$8 sps:$4 sm:$0xff]   ;;  %v3841_v5 = vld [vmem:[#allocation4] ss:$8 sps:$4 sm:$0xff]  }
 0x117   :  { %1986 = vmatprep.subr.bf16.mxu1 %v3783_v6  ;;  %v3883_v6 = vld [vmem:[#allocation4 + $0x120] ss:$8 sps:$4 sm:$0xff]  }
 0x119   :  { %1946 = vmatpush2.bf16.msra.mxu0 %v3778_v7  ;;  %v3846_v7 = vld [vmem:[#allocation4 + $0xf4] ss:$8 sps:$4 sm:$0xff]  }
 0x11a   :  { %1987 = vmatpush2.bf16.msra.mxu1 %v3781_v8  ;;  %1947 = vmatprep.subr.bf16.mxu0 %v3786_v9  ;;  %v3888_v8 = vld [vmem:[#allocation4 + $0x114] ss:$8 sps:$4 sm:$0xff]   ;;  %v3844_v9 = vld [vmem:[#allocation4 + $0xf0] ss:$8 sps:$4 sm:$0xff]  }
 0x11b   :  { %1988 = vmatprep.subr.bf16.mxu1 %v3789_v10  ;;  %v3886_v10 = vld [vmem:[#allocation4 + $0x110] ss:$8 sps:$4 sm:$0xff]  }
 0x11d   :  { %1948 = vmatpush2.bf16.msra.mxu0 %v3784_v11  ;;  %v3849_v11 = vld [vmem:[#allocation4 + $0xe4] ss:$8 sps:$4 sm:$0xff]  }
 0x11e   :  { %1989 = vmatpush2.bf16.msra.mxu1 %v3787_v12  ;;  %1949 = vmatprep.subr.bf16.mxu0 %v3792_v13  ;;  %v3891_v12 = vld [vmem:[#allocation4 + $0x104] ss:$8 sps:$4 sm:$0xff]   ;;  %v3847_v13 = vld [vmem:[#allocation4 + $0xe0] ss:$8 sps:$4 sm:$0xff]  }
 0x11f   :  { %1990 = vmatprep.subr.bf16.mxu1 %v3795_v15  ;;  %v3889_v15 = vld [vmem:[#allocation4 + $0x100] ss:$8 sps:$4 sm:$0xff]  }
 0x121   :  { %1950 = vmatpush2.bf16.msra.mxu0 %v3790_v16  ;;  %v3852_v16 = vld [vmem:[#allocation4 + $0xd4] ss:$8 sps:$4 sm:$0xff]  }
 0x122   :  { %1991 = vmatpush2.bf16.msra.mxu1 %v3793_v17  ;;  %1951 = vmatprep.subr.bf16.mxu0 %v3798_v20  ;;  %v3894_v17 = vld [vmem:[#allocation4 + $0x1f4] ss:$8 sps:$4 sm:$0xff]   ;;  %v3850_v20 = vld [vmem:[#allocation4 + $0xd0] ss:$8 sps:$4 sm:$0xff]  }
 0x123   :  { %1992 = vmatprep.subr.bf16.mxu1 %v3801_v21  ;;  %v3892_v21 = vld [vmem:[#allocation4 + $0x1f0] ss:$8 sps:$4 sm:$0xff]  }
 0x125   :  { %1952 = vmatpush2.bf16.msra.mxu0 %v3796_v22  ;;  %v3855_v22 = vld [vmem:[#allocation4 + $0xc4] ss:$8 sps:$4 sm:$0xff]  }
 0x126   :  { %1993 = vmatpush2.bf16.msra.mxu1 %v3799_v23  ;;  %1953 = vmatprep.subr.bf16.mxu0 %v3804_v25  ;;  %v3897_v23 = vld [vmem:[#allocation4 + $0x1e4] ss:$8 sps:$4 sm:$0xff]   ;;  %v3853_v25 = vld [vmem:[#allocation4 + $0xc0] ss:$8 sps:$4 sm:$0xff]  }
 0x127   :  { %1994 = vmatprep.subr.bf16.mxu1 %v3807_v26  ;;  %v3895_v26 = vld [vmem:[#allocation4 + $0x1e0] ss:$8 sps:$4 sm:$0xff]  }
 0x129   :  { %1954 = vmatpush2.bf16.msra.mxu0 %v3802_v27  ;;  %v3858_v27 = vld [vmem:[#allocation4 + $0xb4] ss:$8 sps:$4 sm:$0xff]  }
 0x12a   :  { %1995 = vmatpush2.bf16.msra.mxu1 %v3805_v28  ;;  %1955 = vmatprep.subr.bf16.mxu0 %v3810_v30  ;;  %v3900_v28 = vld [vmem:[#allocation4 + $0x1d4] ss:$8 sps:$4 sm:$0xff]   ;;  %v3856_v30 = vld [vmem:[#allocation4 + $0xb0] ss:$8 sps:$4 sm:$0xff]  }
 0x12b   :  { %1996 = vmatprep.subr.bf16.mxu1 %v3813_v31  ;;  %v3898_v31 = vld [vmem:[#allocation4 + $0x1d0] ss:$8 sps:$4 sm:$0xff]  }
 0x12d   :  { %1956 = vmatpush2.bf16.msra.mxu0 %v3808_v32  ;;  %v3861_v32 = vld [vmem:[#allocation4 + $0xa4] ss:$8 sps:$4 sm:$0xff]  }
 0x12e   :  { %1997 = vmatpush2.bf16.msra.mxu1 %v3811_v33  ;;  %1957 = vmatprep.subr.bf16.mxu0 %v3816_v34  ;;  %v3903_v33 = vld [vmem:[#allocation4 + $0x1c4] ss:$8 sps:$4 sm:$0xff]   ;;  %v3859_v34 = vld [vmem:[#allocation4 + $0xa0] ss:$8 sps:$4 sm:$0xff]  }
 0x12f   :  { %1998 = vmatprep.subr.bf16.mxu1 %v3819_v35  ;;  %v3901_v35 = vld [vmem:[#allocation4 + $0x1c0] ss:$8 sps:$4 sm:$0xff]  }
 0x131   :  { %1958 = vmatpush2.bf16.msra.mxu0 %v3814_v36  ;;  %v3864_v36 = vld [vmem:[#allocation4 + $0x94] ss:$8 sps:$4 sm:$0xff]  }
 0x132   :  { %1999 = vmatpush2.bf16.msra.mxu1 %v3817_v37  ;;  %2409 = vmatprep.subr.bf16.mxu0 %v3822_v38  ;;  %v3906_v37 = vld [vmem:[#allocation4 + $0x1b4] ss:$8 sps:$4 sm:$0xff]   ;;  %v3862_v38 = vld [vmem:[#allocation4 + $0x90] ss:$8 sps:$4 sm:$0xff]  }
 0x134   :  { %v1715_v41 = vpop.f32.mrf.mxu0  ;;  %1960 = vmatmul.mubr.bf16.vlgmr.msra.gmra.mxu0 %v4090_v63  ;;  %v3831_v63 = vld [vmem:[#allocation4 + $0x44] ss:$8 sps:$4 sm:$0xff]  }
 0x135   :  { %v1756_v42 = vpop.f32.mrf.mxu1  ;;  %2001 = vmatmul.mubr.bf16.vlgmr.msra.gmra.mxu1 %v4116_v29  ;;  %2410 = vmatpush1.bf16.msra.mxu0 %v3820_v39  ;;  %v3870_v29 = vld [vmem:[#allocation4 + $0x174] ss:$8 sps:$4 sm:$0xff]   ;;  %v3904_v39 = vld [vmem:[#allocation4 + $0x1b0] ss:$8 sps:$4 sm:$0xff]  }
 0x136   :  { %v4128_v44 = vadd.f32 %v1756_v42, %v1715_v41  ;;  %v4130_v46 = vpop.f32.mrf.mxu0  ;;  %2411 = vmatprep.subr.bf16.mxu0 %v3825_v40  ;;  %2450 = vmatprep.subr.bf16.mxu1 %v3870_v29  ;;  %v3867_v40 = vld [vmem:[#allocation4 + $0x84] ss:$8 sps:$4 sm:$0xff]   ;;  %v3865_v41 = vld [vmem:[#allocation4 + $0x80] ss:$8 sps:$4 sm:$0xff]   ;;  %v3912_v29 = vld [vmem:[#allocation4 + $0x194] ss:$8 sps:$4 sm:$0xff]  }
 0x137   :  { %v4132_v47 = vpop.f32.mrf.mxu1  ;;  %2451 = vmatpush1.bf16.msra.mxu1 %v3868_v50  ;;  %v3909_v42 = vld [vmem:[#allocation4 + $0x1a4] ss:$8 sps:$4 sm:$0xff]  }
 0x138   :  { %v1719_v3 = vpop.f32.mrf.mxu0  ;;  %2452 = vmatprep.subr.bf16.mxu1 %v3873_v18 }
 0x139   :  { %v1760_v14 = vpop.f32.mrf.mxu1  ;;  %2412 = vmatpush1.bf16.msra.mxu0 %v3823_v45  ;;  %v3907_v3 = vld [vmem:[#allocation4 + $0x1a0] ss:$8 sps:$4 sm:$0xff]  }
 0x13a   :  { %v1720_v48 = vpop.f32.mrf.mxu0  ;;  %2413 = vmatprep.subr.bf16.mxu0 %v3828_v62  ;;  %v1759_v14 = vadd.f32 %v4132_v47, %v4130_v46 }
 0x13b   :  { %v1761_v49 = vpop.f32.mrf.mxu1  ;;  %2453 = vmatpush1.bf16.msra.mxu1 %v3871_v51  ;;  %v3910_v51 = vld [vmem:[#allocation4 + $0x190] ss:$8 sps:$4 sm:$0xff]  }
 0x13c   :  { %2454 = vmatprep.subr.bf16.mxu1 %v3876_v53 }
 0x13d   :  { %2414 = vmatpush1.bf16.msra.mxu0 %v3826_v19 }
 0x13e   :  { %2415 = vmatprep.subr.bf16.mxu0 %v3831_v63 }
 0x13f   :  { %2455 = vmatpush1.bf16.msra.mxu1 %v3874_v55 }
 0x140   :  { %2456 = vmatprep.subr.bf16.mxu1 %v3879_v57 }
 0x141   :  { %2416 = vmatpush1.bf16.msra.mxu0 %v3829_v24 }
 0x142   :  { %2417 = vmatprep.subr.bf16.mxu0 %v3834_v52 }
 0x143   :  { %2457 = vmatpush1.bf16.msra.mxu1 %v3877_v59 }
 0x144   :  { %2458 = vmatprep.subr.bf16.mxu1 %v3882_v61 }
 0x145   :  { %2418 = vmatpush1.bf16.msra.mxu0 %v3832_v54 }
 0x146   :  { %2419 = vmatprep.subr.bf16.mxu0 %v3837_v56  ;;  %v3913_v56 = vld [vmem:[#allocation4 + $0x180] ss:$8 sps:$4 sm:$0xff]  }
 0x147   :  { %2459 = vmatpush1.bf16.msra.mxu1 %v3880_v1 }
 0x148   :  { %2460 = vmatprep.subr.bf16.mxu1 %v3885_v4 }
 0x149   :  { %2420 = vmatpush1.bf16.msra.mxu0 %v3835_v58 }
 0x14a   :  { %2421 = vmatprep.subr.bf16.mxu0 %v3840_v60 }
 0x14b   :  { %2461 = vmatpush1.bf16.msra.mxu1 %v3883_v6 }
 0x14c   :  { %2462 = vmatprep.subr.bf16.mxu1 %v3888_v8  ;;  %v2522_v8 = vld [vmem:[#allocation6 + $0xf8] sm:$0xff] }
 0x14d   :  { %2422 = vmatpush1.bf16.msra.mxu0 %v3838_v0 }
 0x14e   :  { %2423 = vmatprep.subr.bf16.mxu0 %v3843_v2 }
 0x14f   :  { %2463 = vmatpush1.bf16.msra.mxu1 %v3886_v10  ;;  %v4141_v10 = vld [vmem:[#allocation6 + $0xf0] sm:$0xff] }
 0x150   :  { %2464 = vmatprep.subr.bf16.mxu1 %v3891_v12  ;;  %v4146_v12 = vld [vmem:[#allocation6 + $0xe8] sm:$0xff] }
 0x151   :  { %2424 = vmatpush1.bf16.msra.mxu0 %v3841_v5 }
 0x152   :  { %2425 = vmatprep.subr.bf16.mxu0 %v3846_v7 }
 0x153   :  { %2465 = vmatpush1.bf16.msra.mxu1 %v3889_v15  ;;  %v4152_v15 = vld [vmem:[#allocation6 + $0xe0] sm:$0xff] }
 0x154   :  { %2466 = vmatprep.subr.bf16.mxu1 %v3894_v17  ;;  %v4158_v17 = vld [vmem:[#allocation6 + $0xd8] sm:$0xff] }
 0x155   :  { %2426 = vmatpush2.bf16.msra.mxu0 %v3844_v9  ;;  %v4139_v9 = vld [vmem:[#allocation6 + $0x78] sm:$0xff] }
 0x156   :  { %2427 = vmatprep.subr.bf16.mxu0 %v3849_v11  ;;  %v4143_v11 = vld [vmem:[#allocation6 + $0x70] sm:$0xff] }
 0x157   :  { %2467 = vmatpush2.bf16.msra.mxu1 %v3892_v21  ;;  %v4164_v21 = vld [vmem:[#allocation6 + $0xd0] sm:$0xff] }
 0x158   :  { %2468 = vmatprep.subr.bf16.mxu1 %v3897_v23  ;;  %v4170_v23 = vld [vmem:[#allocation6 + $0xc8] sm:$0xff] }
 0x159   :  { %2428 = vmatpush2.bf16.msra.mxu0 %v3847_v13  ;;  %v4149_v13 = vld [vmem:[#allocation6 + $0x68] sm:$0xff] }
 0x15a   :  { %2429 = vmatprep.subr.bf16.mxu0 %v3852_v16  ;;  %v4155_v16 = vld [vmem:[#allocation6 + $0x60] sm:$0xff] }
 0x15b   :  { %2469 = vmatpush2.bf16.msra.mxu1 %v3895_v26  ;;  %v2515_v26 = vld [vmem:[#allocation6 + $0xc0] sm:$0xff] }
 0x15c   :  { %2470 = vmatprep.subr.bf16.mxu1 %v3900_v28  ;;  %v2514_v28 = vld [vmem:[#allocation6 + $0xb8] sm:$0xff] }
 0x15d   :  { %2430 = vmatpush2.bf16.msra.mxu0 %v3850_v20  ;;  %v4161_v20 = vld [vmem:[#allocation6 + $0x58] sm:$0xff] }
 0x15e   :  { %2431 = vmatprep.subr.bf16.mxu0 %v3855_v22  ;;  %v4167_v22 = vld [vmem:[#allocation6 + $0x50] sm:$0xff] }
 0x15f   :  { %2471 = vmatpush2.bf16.msra.mxu1 %v3898_v31  ;;  %v2513_v31 = vld [vmem:[#allocation6 + $0xb0] sm:$0xff] }
 0x160   :  { %2472 = vmatprep.subr.bf16.mxu1 %v3903_v33  ;;  %v2512_v33 = vld [vmem:[#allocation6 + $0xa8] sm:$0xff] }
 0x161   :  { %2432 = vmatpush2.bf16.msra.mxu0 %v3853_v25  ;;  %v2500_v25 = vld [vmem:[#allocation6 + $0x48] sm:$0xff] }
 0x162   :  { %2433 = vmatprep.subr.bf16.mxu0 %v3858_v27  ;;  %v2499_v27 = vld [vmem:[#allocation6 + $0x40] sm:$0xff] }
 0x163   :  { %2473 = vmatpush2.bf16.msra.mxu1 %v3901_v35  ;;  %v2511_v35 = vld [vmem:[#allocation6 + $0xa0] sm:$0xff] }
 0x164   :  { %2474 = vmatprep.subr.bf16.mxu1 %v3906_v37  ;;  %v2510_v37 = vld [vmem:[#allocation6 + $0x98] sm:$0xff] }
 0x165   :  { %2434 = vmatpush2.bf16.msra.mxu0 %v3856_v30  ;;  %v2498_v30 = vld [vmem:[#allocation6 + $0x38] sm:$0xff] }
 0x166   :  { %2435 = vmatprep.subr.bf16.mxu0 %v3861_v32  ;;  %v2497_v32 = vld [vmem:[#allocation6 + $0x30] sm:$0xff] }
 0x167   :  { %2475 = vmatpush2.bf16.msra.mxu1 %v3904_v39 }
 0x168   :  { %2476 = vmatprep.subr.bf16.mxu1 %v3909_v42 }
 0x169   :  { %2436 = vmatpush2.bf16.msra.mxu0 %v3859_v34  ;;  %v2496_v34 = vld [vmem:[#allocation6 + $0x28] sm:$0xff] }
 0x16a   :  { %2437 = vmatprep.subr.bf16.mxu0 %v3864_v36  ;;  %v2495_v36 = vld [vmem:[#allocation6 + $0x20] sm:$0xff] }
 0x16b   :  { %2477 = vmatpush2.bf16.msra.mxu1 %v3907_v3 }
 0x16c   :  { %2478 = vmatprep.subr.bf16.mxu1 %v3912_v29 }
 0x16d   :  { %2438 = vmatpush2.bf16.msra.mxu0 %v3862_v38  ;;  %v2494_v38 = vld [vmem:[#allocation6 + $0x18] sm:$0xff] }
 0x16e   :  { %2439 = vmatprep.subr.bf16.mxu0 %v3867_v40 }
 0x16f   :  { %2479 = vmatpush2.bf16.msra.mxu1 %v3910_v51 }
 0x171   :  { %2440 = vmatpush2.bf16.msra.mxu0 %v3865_v41 }
 0x172   :  { %3320 = vmatprep.subr.mxu0 %v2522_v8 }
 0x174   :  { %v1797_v45 = vpop.f32.mrf.mxu0 }
 0x175   :  { %v1838_v62 = vpop.f32.mrf.mxu1  ;;  %v1798_v19 = vadd.f32 %v1797_v45, %v4128_v44  ;;  %v3915_v44 = vld [vmem:[#allocation4 + $0x184] ss:$8 sps:$4 sm:$0xff]  }
 0x176   :  { %v1799_v48 = vpop.f32.mrf.mxu0  ;;  %2480 = vmatprep.subr.bf16.mxu1 %v3915_v44  ;;  %v2508_v44 = vld [vmem:[#allocation6 + $0x88] sm:$0xff] }
 0x177   :  { %v1840_v49 = vpop.f32.mrf.mxu1  ;;  %v1839_v63 = vadd.f32 %v1838_v62, %v1798_v19  ;;  %v1800_v50 = vadd.f32 %v1799_v48, %v1759_v14  ;;  %2481 = vmatpush2.bf16.msra.mxu1 %v3913_v56  ;;  %v2492_v56 = vld [vmem:[#allocation6 + $0x8] sm:$0xff] }
 0x178   :  { %v1801_v18 = vpop.f32.mrf.mxu0  ;;  %3355 = vmatprep.subr.mxu1 %v2522_v8  ;;  %v2694_v8 = vld [vmem:[#allocation7 + $0x18] sm:$0xff] }
 0x179   :  { %v1842_v24 = vpop.f32.mrf.mxu1  ;;  %vm2009_vm0 = vcmp.gt.f32.partialorder %v1839_v63, 0.0  ;;  %v2013_v52 = vmul.f32 0.2, %v1839_v63  ;;  %v1841_v53 = vadd.f32 %v1840_v49, %v1800_v50 }
 0x17a   :  { %v1802_v54 = vpop.f32.mrf.mxu0 }
 0x17b   :  { %v1843_v55 = vpop.f32.mrf.mxu1  ;;  %vm2010_vm1 = vcmp.gt.f32.partialorder %v1841_v53, 0.0  ;;  %v2014_v46 = vmul.f32 0.2, %v1841_v53  ;;  %v2017_v47 = vsel %vm2009_vm0, %v1839_v63, %v2013_v52  ;;  %v2509_v54 = vld [vmem:[#allocation6 + $0x90] sm:$0xff] }
 0x17c   :  { %v2021_v59 = vpack.c.bf16 %v2017_v47, %v2017_v47 }
 0x17d   :  { %v2018_v57 = vsel %vm2010_vm1, %v1841_v53, %v2014_v46  ;;  %v2493_v46 = vld [vmem:[#allocation6 + $0x10] sm:$0xff] }
 0x17e   :  { %v2022_v58 = vpack.c.bf16 %v2018_v57, %v2018_v57  ;;  %v2507_v57 = vld [vmem:[#allocation6 + $0x80] sm:$0xff] }
 0x180   :  { %2441 = vmatprep.mubr.bf16.mxu0 %v2022_v58 }
 0x181   :  { %2442 = vmatmul.mubr.bf16.vlgmr.msra.gmra.mxu0 %v2021_v59  ;;  %v2491_v59 = vld [vmem:[#allocation6] sm:$0xff] }
 0x182   :  { %3321 = vmatpush3.msra.mxu0 %v4139_v9 }
 0x183   :  { %3322 = vmatprep.subr.mxu0 %v4141_v10 }
 0x184   :  { %3323 = vmatpush3.msra.mxu0 %v4143_v11 }
 0x185   :  { %3324 = vmatprep.subr.mxu0 %v4146_v12 }
 0x186   :  { %3325 = vmatpush3.msra.mxu0 %v4149_v13 }
 0x187   :  { %3326 = vmatprep.subr.mxu0 %v4152_v15 }
 0x188   :  { %3327 = vmatpush3.msra.mxu0 %v4155_v16 }
 0x189   :  { %3328 = vmatprep.subr.mxu0 %v4158_v17 }
 0x18a   :  { %3329 = vmatpush3.msra.mxu0 %v4161_v20 }
 0x18b   :  { %3330 = vmatprep.subr.mxu0 %v4164_v21 }
 0x18c   :  { %3331 = vmatpush3.msra.mxu0 %v4167_v22 }
 0x18d   :  { %3332 = vmatprep.subr.mxu0 %v4170_v23 }
 0x18e   :  { %3333 = vmatpush3.msra.mxu0 %v2500_v25 }
 0x18f   :  { %3334 = vmatprep.subr.mxu0 %v2515_v26 }
 0x190   :  { %3335 = vmatpush3.msra.mxu0 %v2499_v27 }
 0x191   :  { %3336 = vmatprep.subr.mxu0 %v2514_v28 }
 0x192   :  { %3337 = vmatpush3.msra.mxu0 %v2498_v30 }
 0x193   :  { %3338 = vmatprep.subr.mxu0 %v2513_v31 }
 0x194   :  { %3339 = vmatpush3.msra.mxu0 %v2497_v32 }
 0x195   :  { %3340 = vmatprep.subr.mxu0 %v2512_v33 }
 0x196   :  { %3341 = vmatpush3.msra.mxu0 %v2496_v34 }
 0x197   :  { %3342 = vmatprep.subr.mxu0 %v2511_v35 }
 0x198   :  { %3343 = vmatpush3.msra.mxu0 %v2495_v36 }
 0x199   :  { %3344 = vmatprep.subr.mxu0 %v2510_v37 }
 0x19a   :  { %3345 = vmatpush3.msra.mxu0 %v2494_v38 }
 0x19b   :  { %3346 = vmatprep.subr.mxu0 %v2509_v54 }
 0x19c   :  { %3347 = vmatpush3.msra.mxu0 %v2493_v46 }
 0x19d   :  { %3348 = vmatprep.subr.mxu0 %v2508_v44 }
 0x19e   :  { %3349 = vmatpush3.msra.mxu0 %v2492_v56 }
 0x19f   :  { %3350 = vmatprep.subr.mxu0 %v2507_v57 }
 0x1a0   :  { %3351 = vmatpush3.msra.mxu0 %v2491_v59 }
 0x1b4   :  { %v1879_v60 = vpop.f32.mrf.mxu0 }
 0x1b5   :  { %v1920_v61 = vpop.f32.mrf.mxu1 }
 0x1b6   :  { %v4137_v0 = vadd.f32 %v1920_v61, %v1879_v60  ;;  %v1881_v1 = vpop.f32.mrf.mxu0 }
 0x1b7   :  { %v1922_v2 = vpop.f32.mrf.mxu1 }
 0x1b8   :  { %v1883_v4 = vpop.f32.mrf.mxu0  ;;  %v1923_v41 = vadd.f32 %v1922_v2, %v1881_v1 }
 0x1b9   :  { %v1924_v5 = vpop.f32.mrf.mxu1 }
 0x1ba   :  { %v1884_v6 = vpop.f32.mrf.mxu0 }
 0x1bb   :  { %v1925_v7 = vpop.f32.mrf.mxu1 }
 0x1f4   :  { %v1961_v39 = vpop.f32.mrf.mxu0 }
 0x1f5   :  { %v2002_v40 = vpop.f32.mrf.mxu1  ;;  %v1962_v42 = vadd.f32 %v1961_v39, %v4137_v0 }
 0x1f6   :  { %v1963_v45 = vpop.f32.mrf.mxu0 }
 0x1f7   :  { %v2004_v62 = vpop.f32.mrf.mxu1  ;;  %v2003_v3 = vadd.f32 %v2002_v40, %v1962_v42  ;;  %v1964_v14 = vadd.f32 %v1963_v45, %v1923_v41 }
 0x1f8   :  { %v1965_v19 = vpop.f32.mrf.mxu0 }
 0x1f9   :  { %v2006_v48 = vpop.f32.mrf.mxu1  ;;  %vm2011_vm2 = vcmp.gt.f32.partialorder %v2003_v3, 0.0  ;;  %v2015_v49 = vmul.f32 0.2, %v2003_v3  ;;  %v2005_v63 = vadd.f32 %v2004_v62, %v1964_v14 }
 0x1fa   :  { %v1966_v50 = vpop.f32.mrf.mxu0 }
 0x1fb   :  { %v2007_v29 = vpop.f32.mrf.mxu1  ;;  %vm2012_vm3 = vcmp.gt.f32.partialorder %v2005_v63, 0.0  ;;  %v2016_v18 = vmul.f32 0.2, %v2005_v63  ;;  %v2019_v24 = vsel %vm2011_vm2, %v2003_v3, %v2015_v49 }
 0x1fc   :  { %v2023_v53 = vpack.c.bf16 %v2019_v24, %v2019_v24 }
 0x1fd   :  { %v2020_v51 = vsel %vm2012_vm3, %v2005_v63, %v2016_v18 }
 0x1fe   :  { %v2024_v52 = vpack.c.bf16 %v2020_v51, %v2020_v51 }
 0x200   :  { %2482 = vmatprep.mubr.bf16.mxu1 %v2024_v52 }
 0x201   :  { %2483 = vmatmul.mubr.bf16.vlgmr.msra.gmra.mxu1 %v2023_v53 }
 0x202   :  { %3356 = vmatpush3.msra.mxu1 %v4139_v9  ;;  %v4198_v9 = vld [vmem:[#allocation7 + $0x10] sm:$0xff] }
 0x203   :  { %3357 = vmatprep.subr.mxu1 %v4141_v10  ;;  %v4200_v10 = vld [vmem:[#allocation7 + $0x8] sm:$0xff] }
 0x204   :  { %3358 = vmatpush3.msra.mxu1 %v4143_v11  ;;  %v4202_v11 = vld [vmem:[#allocation7] sm:$0xff] }
 0x205   :  { %3359 = vmatprep.subr.mxu1 %v4146_v12  ;;  %v4013_v12 = vmov 0.0  }
 0x206   :  { %3360 = vmatpush3.msra.mxu1 %v4149_v13  ;;  %v2913_v13 = vld [vmem:[%s4330_s7 + $0xf8] sm:$0xff] }
 0x207   :  { %3361 = vmatprep.subr.mxu1 %v4152_v15  ;;  %v2897_v15 = vld [vmem:[%s4330_s7 + $0x78] sm:$0xff]  ;;  %3390 = vmatprep.subr.mxu0 %v2913_v13  ;;  %v2898_v13 = vld [vmem:[%s4330_s7 + $0x80] sm:$0xff] }
 0x208   :  { %3362 = vmatpush3.msra.mxu1 %v4155_v16  ;;  %v2912_v16 = vld [vmem:[%s4330_s7 + $0xf0] sm:$0xff] }
 0x209   :  { %3363 = vmatprep.subr.mxu1 %v4158_v17  ;;  %v2896_v17 = vld [vmem:[%s4330_s7 + $0x70] sm:$0xff] }
 0x20a   :  { %3364 = vmatpush3.msra.mxu1 %v4161_v20  ;;  %v2911_v20 = vld [vmem:[%s4330_s7 + $0xe8] sm:$0xff] }
 0x20b   :  { %3365 = vmatprep.subr.mxu1 %v4164_v21  ;;  %v2895_v21 = vld [vmem:[%s4330_s7 + $0x68] sm:$0xff] }
 0x20c   :  { %3366 = vmatpush3.msra.mxu1 %v4167_v22  ;;  %v2910_v22 = vld [vmem:[%s4330_s7 + $0xe0] sm:$0xff] }
 0x20d   :  { %3367 = vmatprep.subr.mxu1 %v4170_v23  ;;  %v2894_v23 = vld [vmem:[%s4330_s7 + $0x60] sm:$0xff] }
 0x20e   :  { %3368 = vmatpush3.msra.mxu1 %v2500_v25  ;;  %v2909_v25 = vld [vmem:[%s4330_s7 + $0xd8] sm:$0xff] }
 0x20f   :  { %3369 = vmatprep.subr.mxu1 %v2515_v26  ;;  %v2893_v26 = vld [vmem:[%s4330_s7 + $0x58] sm:$0xff] }
 0x210   :  { %3370 = vmatpush3.msra.mxu1 %v2499_v27  ;;  %v2908_v27 = vld [vmem:[%s4330_s7 + $0xd0] sm:$0xff] }
 0x211   :  { %3371 = vmatprep.subr.mxu1 %v2514_v28  ;;  %v2892_v28 = vld [vmem:[%s4330_s7 + $0x50] sm:$0xff] }
 0x212   :  { %3372 = vmatpush3.msra.mxu1 %v2498_v30  ;;  %v2907_v30 = vld [vmem:[%s4330_s7 + $0xc8] sm:$0xff] }
 0x213   :  { %3373 = vmatprep.subr.mxu1 %v2513_v31  ;;  %v2891_v31 = vld [vmem:[%s4330_s7 + $0x48] sm:$0xff] }
 0x214   :  { %3374 = vmatpush3.msra.mxu1 %v2497_v32  ;;  %v2906_v32 = vld [vmem:[%s4330_s7 + $0xc0] sm:$0xff] }
 0x215   :  { %3375 = vmatprep.subr.mxu1 %v2512_v33  ;;  %v2890_v33 = vld [vmem:[%s4330_s7 + $0x40] sm:$0xff] }
 0x216   :  { %3376 = vmatpush3.msra.mxu1 %v2496_v34  ;;  %v2905_v34 = vld [vmem:[%s4330_s7 + $0xb8] sm:$0xff] }
 0x217   :  { %3377 = vmatprep.subr.mxu1 %v2511_v35 }
 0x218   :  { %3378 = vmatpush3.msra.mxu1 %v2495_v36 }
 0x219   :  { %3379 = vmatprep.subr.mxu1 %v2510_v37 }
 0x21a   :  { %3380 = vmatpush3.msra.mxu1 %v2494_v38 }
 0x21b   :  { %3381 = vmatprep.subr.mxu1 %v2509_v54 }
 0x21c   :  { %3382 = vmatpush3.msra.mxu1 %v2493_v46  ;;  %v2684_v46 = vld [vmem:[%s4326_s3] sm:$0x1] }
 0x21d   :  { %3383 = vmatprep.subr.mxu1 %v2508_v44 }
 0x21e   :  { %3384 = vmatpush3.msra.mxu1 %v2492_v56  ;;  %v2688_v56 = vld [vmem:[%s4327_s4] sm:$0x1] }
 0x21f   :  { %3385 = vmatprep.subr.mxu1 %v2507_v57 }
 0x220   :  { %3386 = vmatpush3.msra.mxu1 %v2491_v59  ;;  %v2889_v59 = vld [vmem:[%s4330_s7 + $0x38] sm:$0xff] }
 0x221   :  { %2727 = vmatprep.subr.mxu1 %v2694_v8 }
 0x241   :  { %v2443_v55 = vpop.f32.mrf.mxu0 }
 0x243   :  { %v2445_v47 = vpop.f32.mrf.mxu0 }
 0x245   :  { %v2447_v58 = vpop.f32.mrf.mxu0 }
 0x247   :  { %v2448_v60 = vpop.f32.mrf.mxu0 }
 0x248   :  { %v2904_v60 = vld [vmem:[%s4330_s7 + $0xb0] sm:$0xff] }
 0x2c1   :  { %v2484_v61 = vpop.f32.mrf.mxu1 }
 0x2c2   :  { %v4188_v0 = vadd.f32 %v2484_v61, %v2443_v55  ;;  %v2888_v61 = vld [vmem:[%s4330_s7 + $0x30] sm:$0xff] }
 0x2c3   :  { %v2486_v1 = vpop.f32.mrf.mxu1 }
 0x2c4   :  { %v4190_v2 = vadd.f32 %v2486_v1, %v2445_v47  ;;  %v2593_v6 = vmul.f32 %v4188_v0, %v4188_v0  ;;  %v2903_v1 = vld [vmem:[%s4330_s7 + $0xa8] sm:$0xff] }
 0x2c5   :  { %v2488_v4 = vpop.f32.mrf.mxu1 }
 0x2c6   :  { %2587 = vmatprep.mubr.f32.mxu0 %v4190_v2  ;;  %v2594_v5 = vmul.f32 %v4190_v2, %v4190_v2  ;;  %v2887_v4 = vld [vmem:[%s4330_s7 + $0x28] sm:$0xff] }
 0x2c7   :  { %v2489_v7 = vpop.f32.mrf.mxu1  ;;  %2588 = vmatmul.mubr.f32.vlgmr.msra.gmra.mxu0 %v4188_v0 }
 0x2c8   :  { %2659 = vmatprep.mubr.f32.mxu1 %v2594_v5  ;;  %3391 = vmatpush3.msra.mxu0 %v2897_v15  ;;  %v2902_v5 = vld [vmem:[%s4330_s7 + $0xa0] sm:$0xff]  ;;  %v2901_v7 = vld [vmem:[%s4330_s7 + $0x98] sm:$0xff] }
 0x2c9   :  { %2660 = vmatmul.mubr.f32.vlgmr.msra.gmra.mxu1 %v2593_v6  ;;  %3392 = vmatprep.subr.mxu0 %v2912_v16  ;;  %v2886_v6 = vld [vmem:[%s4330_s7 + $0x20] sm:$0xff]  ;;  %v2846_v16 = vsub.s32 0, %v4082_v43 }
 0x2ca   :  { %2763 = vmatprep.mubr.f32.mxu1 %v4013_v12  ;;  %2728 = vmatpush1.msra.mxu1 %v4198_v9  ;;  %v2882_v15 = vld [vmem:[%s4330_s7] sm:$0xff] }
 0x2cb   :  { %2729 = vmatprep.subr.mxu1 %v4200_v10  ;;  %3393 = vmatpush3.msra.mxu0 %v2896_v17 }
 0x2cc   :  { %2730 = vmatpush1.msra.mxu1 %v4202_v11  ;;  %3394 = vmatprep.subr.mxu0 %v2911_v20 }
 0x2cd   :  { %2801 = vmatprep.subr.mxu1 %v2694_v8  ;;  %3395 = vmatpush3.msra.mxu0 %v2895_v21  ;;  %v2885_v8 = vld [vmem:[%s4330_s7 + $0x18] sm:$0xff] }
 0x2ce   :  { %3396 = vmatprep.subr.mxu0 %v2910_v22 }
 0x2cf   :  { %3397 = vmatpush3.msra.mxu0 %v2894_v23 }
 0x2d0   :  { %3398 = vmatprep.subr.mxu0 %v2909_v25 }
 0x2d1   :  { %3399 = vmatpush3.msra.mxu0 %v2893_v26 }
 0x2d2   :  { %3400 = vmatprep.subr.mxu0 %v2908_v27 }
 0x2d3   :  { %3401 = vmatpush3.msra.mxu0 %v2892_v28 }
 0x2d4   :  { %3402 = vmatprep.subr.mxu0 %v2907_v30 }
 0x2d5   :  { %3403 = vmatpush3.msra.mxu0 %v2891_v31 }
 0x2d6   :  { %3404 = vmatprep.subr.mxu0 %v2906_v32 }
 0x2d7   :  { %3405 = vmatpush3.msra.mxu0 %v2890_v33 }
 0x2d8   :  { %3406 = vmatprep.subr.mxu0 %v2905_v34 }
 0x2d9   :  { %3407 = vmatpush3.msra.mxu0 %v2889_v59 }
 0x2da   :  { %3408 = vmatprep.subr.mxu0 %v2904_v60 }
 0x2db   :  { %3409 = vmatpush3.msra.mxu0 %v2888_v61 }
 0x2dc   :  { %3410 = vmatprep.subr.mxu0 %v2903_v1 }
 0x2dd   :  { %3411 = vmatpush3.msra.mxu0 %v2887_v4 }
 0x2de   :  { %3412 = vmatprep.subr.mxu0 %v2902_v5 }
 0x2df   :  { %3413 = vmatpush3.msra.mxu0 %v2886_v6 }
 0x2e0   :  { %3414 = vmatprep.subr.mxu0 %v2901_v7 }
 0x2e1   :  { %3415 = vmatpush3.msra.mxu0 %v2885_v8 }
 0x387   :  { %v3352_v35 = vpop.f32.mrf.mxu0 }
 0x389   :  { %v3353_v36 = vpop.f32.mrf.mxu0  ;;  %v3387_v37 = vpop.f32.mrf.mxu1 }
 0x38a   :  { %v3354_v38 = vadd.f32 %v3353_v36, %v3352_v35 }
 0x38b   :  { %v3388_v39 = vpop.f32.mrf.mxu1 }
 0x38c   :  { %v2666_v40 = vsel %vm2665_vm4, %v3354_v38, 0.0  ;;  %v3389_v41 = vadd.f32 %v3388_v39, %v3387_v37 }
 0x38d   :  { %v2667_v42 = vrot.slane %v2666_v40, 4 }
 0x38e   :  { %v2674_v45 = vsel %vm2665_vm4, %v3389_v41, 0.0 }
 0x38f   :  { %v2668_v62 = vadd.f32 %v2667_v42, %v2666_v40  ;;  %v2675_v3 = vrot.slane %v2674_v45, 4 }
 0x391   :  { %v2669_v14 = vrot.slane %v2668_v62, 2  ;;  %v2676_v19 = vadd.f32 %v2675_v3, %v2674_v45 }
 0x393   :  { %v2670_v48 = vadd.f32 %v2669_v14, %v2668_v62  ;;  %v2677_v49 = vrot.slane %v2676_v19, 2 }
 0x395   :  { %v2671_v63 = vrot.slane %v2670_v48, 1  ;;  %v2678_v50 = vadd.f32 %v2677_v49, %v2676_v19 }
 0x397   :  { %v2672_v29 = vadd.f32 %v2671_v63, %v2670_v48  ;;  %v2679_v18 = vrot.slane %v2678_v50, 1 }
 0x399   :  { %v2673_v24 = vmul.f32 0.03125, %v2672_v29  ;;  %v2680_v51 = vadd.f32 %v2679_v18, %v2678_v50 }
 0x39b   :  { %v2682_v52 = vmul.f32 %v2673_v24, %v2673_v24  ;;  %v2681_v53 = vmul.f32 0.03125, %v2680_v51 }
 0x39d   :  { %v2683_v54 = vsub.f32 %v2681_v53, %v2682_v52 }
 0x39f   :  { %v2685_v55 = vadd.f32 1e-05, %v2683_v54 }
 0x3a1   :  { %3916 = vrsqrt.f32 %v2685_v55 }
 0x3ae   :  { %v3917_v44 = vpop.eup %3916 }
 0x3af   :  { %v2687_v47 = vmul.f32 %v3917_v44, %v2684_v46 }
 0x3b1   :  { %3317 = vmatmul.mubr.msk.f32.vlgmr.msra.gmra.mxu1 %vm2695_vm5, %v2687_v47  ;;  %v2689_v57 = vmul.f32 %v2687_v47, %v2673_v24 }
 0x3b2   :  { %2802 = vmatpush1.msra.mxu1 %v4198_v9  ;;  %2837 = vmatprep.mubr.f32.mxu1 %v4013_v12  ;;  %v2900_v9 = vld [vmem:[%s4330_s7 + $0x90] sm:$0xff]  ;;  %v2883_v12 = vld [vmem:[%s4330_s7 + $0x8] sm:$0xff] }
 0x3b3   :  { %2803 = vmatprep.subr.mxu1 %v4200_v10  ;;  %v2690_v58 = vsub.f32 %v2688_v56, %v2689_v57  ;;  %3416 = vmatprep.subr.mxu0 %v2900_v9  ;;  %v2884_v10 = vld [vmem:[%s4330_s7 + $0x10] sm:$0xff] }
 0x3b4   :  { %2804 = vmatpush1.msra.mxu1 %v4202_v11  ;;  %v2899_v11 = vld [vmem:[%s4330_s7 + $0x88] sm:$0xff]  ;;  %3417 = vmatpush3.msra.mxu0 %v2884_v10 }
 0x3b5   :  { %3318 = vmatmul.mubr.msk.f32.vlgmr.msra.gmra.mxu1 %vm2695_vm5, %v2690_v58  ;;  %3418 = vmatprep.subr.mxu0 %v2899_v11 }
 0x3b6   :  { %3419 = vmatpush3.msra.mxu0 %v2883_v12 }
 0x3b7   :  { %3420 = vmatprep.subr.mxu0 %v2898_v13 }
 0x3b8   :  { %3421 = vmatpush3.msra.mxu0 %v2882_v15 }
 0x471   :  { %v2765_v17 = vpop.f32.mrf.mxu1 }
 0x472   :  { %v2847_v20 = vrot.slane %v2765_v17, %v2846_v16 }
 0x473   :  { %v2767_v21 = vpop.f32.mrf.mxu1 }
 0x474   :  { %v2851_v22 = vrot.slane %v2767_v21, %v2846_v16  ;;  %v2852_v25 = vmul.f32 %v2847_v20, %v4188_v0 }
 0x475   :  { %v2839_v23 = vpop.f32.mrf.mxu1 }
 0x476   :  { %v2857_v26 = vrot.slane %v2839_v23, %v2846_v16  ;;  %v2853_v28 = vmul.f32 %v2851_v22, %v4190_v2 }
 0x477   :  { %v2841_v27 = vpop.f32.mrf.mxu1 }
 0x478   :  { %v2862_v30 = vadd.f32 %v2857_v26, %v2852_v25  ;;  %v2861_v31 = vrot.slane %v2841_v27, %v2846_v16 }
 0x47a   :  { %v2866_v32 = vmul.f32 0.2, %v2862_v30  ;;  %v2863_v33 = vadd.f32 %v2861_v31, %v2853_v28  ;;  %vm2864_vm6 = vcmp.gt.f32.partialorder %v2862_v30, 0.0 }
 0x47c   :  { %vm2865_vm7 = vcmp.gt.f32.partialorder %v2863_v33, 0.0  ;;  %v2867_v34 = vmul.f32 0.2, %v2863_v33  ;;  %v2868_v35 = vsel %vm2864_vm6, %v2862_v30, %v2866_v32 }
 0x47e   :  { %v2869_v43 = vsel %vm2865_vm7, %v2863_v33, %v2867_v34 }
 0x47f   :  { %v2872_v36 = vcombine.low %v2868_v35, %v2869_v43  ;;  %2978 = vmatprep.mubr.f32.mxu0 %v2869_v43 }
 0x480   :  { %2979 = vmatmul.mubr.f32.vlgmr.msra.gmra.mxu0 %v2868_v35 }
 0x481   :  { %3319 = vst.sshfl [vmem:[%s4331_s8] sm:$0x33 pattern:$0x76325410] %v2872_v36 }
 0x540   :  { %v3422_v0 = vpop.f32.mrf.mxu0 }
 0x542   :  { %v3423_v37 = vpop.f32.mrf.mxu0 }
 0x543   :  { %v3424_v2 = vadd.f32 %v3423_v37, %v3422_v0 }
 0x545   :  { %2985 = vst.msk [vmem:[%s4332_s9] sm:$0x3] %vm2984_vm8, %v3424_v2 }
 0x546   :  { %2994 = vsyncpa [#allocation3], 1 }
 0x547   :  { %2995 = vsyncpa [#allocation5], 1 }
 0x548   :  { %2996 = vsyncpa [#allocation8], 1 }

</bundles_post_ra>
